<compile_context>
chip_gen: v6e
topology: v6e:2x2x1
jax: 0.10.0
libtpu: 0.0.40
codegen_flags: <defaults>
</compile_context>

<pallas_src>
import math

import jax
import jax.numpy as jnp
from jax.experimental import pallas as pl
from jax.experimental.pallas import tpu as pltpu

# ----------------------- model config (synthetic, small) -----------------------
VOCAB = 128        # vocab size
MAX_POS = 64       # max position embeddings
H = 64             # hidden size        (768 in distilbert-base)
NH = 4             # attention heads    (12 in distilbert-base)
DH = H // NH       # head dim
FFN = 4 * H        # ffn inner dim
LAYERS = 2         # transformer blocks (6 in distilbert-base)
NUM_LABELS = 3
EPS = 1e-12        # DistilBERT layernorm eps


# ------------------------------ helpers ----------------------------------------
def _cparams(n_axes=1):
    # parallel on every grid axis: shards across the 2 TensorCores on v7x, neutral on
    # v5e/v6e.  vmem_limit_bytes set explicitly (raises v5e's 16 MiB scoped default;
    # matches the v6e/v7x default).  At real DistilBERT shapes, also mark the
    # grid-invariant weight BlockSpecs below with pipeline_mode=pl.Buffered(1) to halve
    # their VMEM footprint on v7x's 64 MiB.
    return pltpu.CompilerParams(
        dimension_semantics=("parallel",) * n_axes,
        vmem_limit_bytes=32 * 1024 * 1024)


def _row_tile(M, min_steps=2, cap=256):
    """Sublane-aligned row tile that yields >= min_steps grid steps (for megacore +
    pipelining), capped so double-buffered tiles fit every generation's VMEM."""
    if M <= 8:
        return M
    tm = min(cap, max(8, (M // min_steps) // 8 * 8))
    while M % tm != 0:          # keep grid exact (kernels don't handle ragged tiles)
        tm -= 8
    return max(tm, 8)


def _layernorm_f32(y, g, b):
    mean = jnp.mean(y, axis=-1, keepdims=True)
    var = jnp.mean((y - mean) * (y - mean), axis=-1, keepdims=True)
    return (y - mean) * jax.lax.rsqrt(var + EPS) * g + b


# ------------------------------ Pallas kernels ---------------------------------
def _ln_kernel(x_ref, g_ref, b_ref, o_ref):
    """Row-wise LayerNorm (embeddings). Math in f32, output bf16."""
    x = x_ref[...].astype(jnp.float32)
    o_ref[...] = _layernorm_f32(x, g_ref[...], b_ref[...]).astype(o_ref.dtype)


def layernorm(x2d, g, b):
    M, N = x2d.shape
    tm = _row_tile(M)
    return pl.pallas_call(
        _ln_kernel,
        out_shape=jax.ShapeDtypeStruct((M, N), jnp.bfloat16),   # bf16 inter-kernel activation
        grid=(M // tm,),
        in_specs=[pl.BlockSpec((tm, N), lambda i: (i, 0)),
                  pl.BlockSpec((1, N), lambda i: (0, 0)),
                  pl.BlockSpec((1, N), lambda i: (0, 0))],
        out_specs=pl.BlockSpec((tm, N), lambda i: (i, 0)),
        compiler_params=_cparams(),
    )(x2d, g.reshape(1, N), b.reshape(1, N))


def _layer_kernel(x_ref, bias_ref,
                  qkv_w_ref, qkv_b_ref,
                  o_w_ref, o_b_ref, sa_g_ref, sa_b_ref,
                  ff1_w_ref, ff1_b_ref, ff2_w_ref, ff2_b_ref,
                  out_g_ref, out_b_ref,
                  o_ref):
    """One full transformer layer for one example (grid over batch).

    QKV/ctx/FFN intermediates never leave VMEM; a single (S, H) block is stored.
    """
    S_ = x_ref.shape[1]
    x_bf = x_ref[0]                                                     # (S, H) bf16
    bias = bias_ref[0]                                                  # (1, S) additive mask

    # ---- fused, lane-dense QKV projection: one MXU matmul, (S, 3H) stays in VMEM
    qkv = jnp.dot(x_bf, qkv_w_ref[...],
                  preferred_element_type=jnp.float32) + qkv_b_ref[...]  # (S, 3H) f32
    qkv = qkv.astype(jnp.bfloat16)

    # ---- per-head attention; heads sliced by lane offset, contexts merged in VMEM.
    # Static unroll keeps back-to-back vmatmul pushes; at real NH=12 / S=512 convert
    # to lax.fori_loop(unroll=True) or a batched einsum to bound vreg live ranges.
    scale = 1.0 / math.sqrt(DH)
    ctx_heads = []
    for h in range(NH):
        qh = qkv[:, h * DH:(h + 1) * DH]                                # (S, DH)
        kh = qkv[:, H + h * DH: H + (h + 1) * DH]
        vh = qkv[:, 2 * H + h * DH: 2 * H + (h + 1) * DH]
        s = jax.lax.dot_general(qh, kh, (((1,), (1,)), ((), ())),
                                preferred_element_type=jnp.float32) * scale   # (S, S)
        s = s + bias                                                    # broadcast over rows
        m = jnp.max(s, axis=-1, keepdims=True)
        p = jnp.exp(s - m)
        l = jnp.sum(p, axis=-1, keepdims=True)
        probs = p * pl.reciprocal(l, approx=True)                       # EUP, not a divide
        ctx_heads.append(jnp.dot(probs.astype(jnp.bfloat16), vh,
                                 preferred_element_type=jnp.float32))   # (S, DH)
    ctx = jnp.concatenate(ctx_heads, axis=-1).astype(jnp.bfloat16)      # (S, H) single block

    # ---- attention output projection + residual + LayerNorm (f32 math)
    y = jnp.dot(ctx, o_w_ref[...],
                preferred_element_type=jnp.float32) + o_b_ref[...]
    y = y + x_bf.astype(jnp.float32)
    x1 = _layernorm_f32(y, sa_g_ref[...], sa_b_ref[...])                # (S, H) f32

    # ---- FFN1 + GELU + FFN2 + residual + LayerNorm; (S, FFN) never leaves VMEM
    h1 = jnp.dot(x1.astype(jnp.bfloat16), ff1_w_ref[...],
                 preferred_element_type=jnp.float32) + ff1_b_ref[...]
    # TODO(synk): HF DistilBERT uses exact (erf) GELU; tanh approximation used here.
    h1 = jax.nn.gelu(h1, approximate=True)
    y2 = jnp.dot(h1.astype(jnp.bfloat16), ff2_w_ref[...],
                 preferred_element_type=jnp.float32) + ff2_b_ref[...]
    y2 = y2 + x1
    o_ref[0] = _layernorm_f32(y2, out_g_ref[...], out_b_ref[...]).astype(o_ref.dtype)


def transformer_layer(x_bsh, bias, lyr):
    B, S_, H_ = x_bsh.shape
    x_spec = pl.BlockSpec((1, S_, H_), lambda b: (b, 0, 0))

    def w_spec(shape):
        nd = len(shape)
        # grid-invariant weight block (index_map constant across the batch grid)
        return pl.BlockSpec(shape, lambda b, _nd=nd: (0,) * _nd)

    return pl.pallas_call(
        _layer_kernel,
        out_shape=jax.ShapeDtypeStruct((B, S_, H_), jnp.bfloat16),      # bf16 activation
        grid=(B,),
        in_specs=[x_spec,
                  pl.BlockSpec((1, 1, S_), lambda b: (b, 0, 0)),        # mask bias
                  w_spec((H_, 3 * H_)), w_spec((1, 3 * H_)),            # qkv
                  w_spec((H_, H_)), w_spec((1, H_)),                    # out proj
                  w_spec((1, H_)), w_spec((1, H_)),                     # sa LN
                  w_spec((H_, FFN)), w_spec((1, FFN)),                  # ffn1
                  w_spec((FFN, H_)), w_spec((1, H_)),                   # ffn2
                  w_spec((1, H_)), w_spec((1, H_))],                    # out LN
        out_specs=x_spec,
        compiler_params=_cparams(),
    )(x_bsh, bias,
      lyr["qkv_w"], lyr["qkv_b"].reshape(1, 3 * H_),
      lyr["o_w"], lyr["o_b"].reshape(1, H_),
      lyr["sa_ln_g"].reshape(1, H_), lyr["sa_ln_b"].reshape(1, H_),
      lyr["ff1_w"], lyr["ff1_b"].reshape(1, FFN),
      lyr["ff2_w"], lyr["ff2_b"].reshape(1, H_),
      lyr["out_ln_g"].reshape(1, H_), lyr["out_ln_b"].reshape(1, H_))


# --------------------------- parameter construction ----------------------------
def init_params(key):
    def dense(k, fan_in, fan_out):
        # weights stored in bf16 (MXU-native; halves weight HBM traffic)
        return (jax.random.normal(k, (fan_in, fan_out), jnp.float32) * 0.02).astype(jnp.bfloat16)

    keys = jax.random.split(key, 4 + LAYERS)
    params = {
        "word_emb": jax.random.normal(keys[0], (VOCAB, H), jnp.float32) * 0.02,
        "pos_emb": jax.random.normal(keys[1], (MAX_POS, H), jnp.float32) * 0.02,
        "emb_ln_g": jnp.ones((H,), jnp.float32),
        "emb_ln_b": jnp.zeros((H,), jnp.float32),
        "clf_w": jax.random.normal(keys[2], (H, NUM_LABELS), jnp.float32) * 0.02,
        "clf_b": jnp.zeros((NUM_LABELS,), jnp.float32),
        "layers": [],
    }
    for l in range(LAYERS):
        lk = jax.random.split(keys[4 + l], 6)
        wq, wk, wv = dense(lk[0], H, H), dense(lk[1], H, H), dense(lk[2], H, H)
        params["layers"].append({
            # fused QKV weight, lane-dense (H, 3H): one matmul, Q/K/V sliced in-kernel
            "qkv_w": jnp.concatenate([wq, wk, wv], axis=1),
            "qkv_b": jnp.zeros((3 * H,), jnp.float32),
            "o_w": dense(lk[3], H, H), "o_b": jnp.zeros((H,), jnp.float32),
            "sa_ln_g": jnp.ones((H,), jnp.float32), "sa_ln_b": jnp.zeros((H,), jnp.float32),
            "ff1_w": dense(lk[4], H, FFN), "ff1_b": jnp.zeros((FFN,), jnp.float32),
            "ff2_w": dense(lk[5], FFN, H), "ff2_b": jnp.zeros((H,), jnp.float32),
            "out_ln_g": jnp.ones((H,), jnp.float32), "out_ln_b": jnp.zeros((H,), jnp.float32),
        })
    return params


# --------------------------------- forward -------------------------------------
def bert_class_forward(params, ids, mask):
    """Equivalent of BERTClass.forward(ids, mask) -> logits (B, NUM_LABELS)."""
    B, S_ = ids.shape
    M = B * S_

    # --- embeddings: word + position (gather kept in XLA), then Pallas LayerNorm
    pos = jnp.arange(S_)
    x = params["word_emb"][ids] + params["pos_emb"][pos][None, :, :]      # (B, S, H) f32
    x2 = layernorm(x.reshape(M, H), params["emb_ln_g"], params["emb_ln_b"])
    x_bsh = x2.reshape(B, S_, H)                                          # (B, S, H) bf16

    # additive attention-mask bias (0 = attend, -1e9 = masked), computed once in f32.
    # Note: a fully-masked row would give a uniform softmax over pad tokens (not NaN),
    # matching HF behavior in practice.
    bias = jnp.where(mask > 0, 0.0, -1e9).astype(jnp.float32).reshape(B, 1, S_)

    # --- transformer blocks: ONE fused pallas_call per layer (grid over batch)
    for lyr in params["layers"]:
        x_bsh = transformer_layer(x_bsh, bias, lyr)

    # --- classifier on the [CLS] token: hidden_state[:, 0]
    # num_labels=3 head stays in XLA: a 3-lane Pallas output is all masked stores/overhead.
    cls_tok = x_bsh[:, 0].astype(jnp.float32)                             # (B, H)
    logits = cls_tok @ params["clf_w"] + params["clf_b"]                  # (B, NUM_LABELS)
    return logits


# ----------------------------------- main ---------------------------------------
if __name__ == "__main__":
    key = jax.random.PRNGKey(0)
    pkey, ikey = jax.random.split(key)
    params = init_params(pkey)

    B, S = 2, 16
    ids = jax.random.randint(ikey, (B, S), 0, VOCAB, dtype=jnp.int32)
    mask = jnp.ones((B, S), jnp.int32).at[1, 12:].set(0)   # pad last 4 tokens of example 1

    fwd = jax.jit(bert_class_forward)
    logits = fwd(params, ids, mask)
    jax.block_until_ready(logits)
    assert logits.shape == (B, NUM_LABELS) and logits.dtype == jnp.float32
    assert bool(jnp.all(jnp.isfinite(logits)))
    print("KERNEL_OK")
</pallas_src>

<mosaic_0001>
module attributes {stable_mosaic.version = 11 : i64} {
  func.func @_ln_kernel(%arg0: i32, %arg1: memref<16x64xf32, #tpu.memory_space<vmem>>, %arg2: memref<1x64xf32, #tpu.memory_space<vmem>>, %arg3: memref<1x64xf32, #tpu.memory_space<vmem>>, %arg4: memref<16x64xbf16, #tpu.memory_space<vmem>>) attributes {dimension_semantics = [#tpu.dimension_semantics<parallel>], iteration_bounds = array<i64: 2>, scalar_prefetch = 0 : i64, scratch_operands = 0 : i64, tpu.core_type = #tpu.core_type<tc>, window_params = [{transform_indices = @transform_0, window_bounds = array<i64: 16, 64>}, {pipeline_mode = #tpu.pipeline_mode<synchronous>, transform_indices = @transform_1, window_bounds = array<i64: 1, 64>}, {pipeline_mode = #tpu.pipeline_mode<synchronous>, transform_indices = @transform_2, window_bounds = array<i64: 1, 64>}, {transform_indices = @transform_3, window_bounds = array<i64: 16, 64>}]} {
    %c0 = arith.constant 0 : index
    %c0_0 = arith.constant 0 : index
    %0 = vector.load %arg1[%c0, %c0_0] : memref<16x64xf32, #tpu.memory_space<vmem>>, vector<16x64xf32>
    %c0_1 = arith.constant 0 : index
    %c0_2 = arith.constant 0 : index
    %1 = vector.load %arg2[%c0_1, %c0_2] : memref<1x64xf32, #tpu.memory_space<vmem>>, vector<1x64xf32>
    %c0_3 = arith.constant 0 : index
    %c0_4 = arith.constant 0 : index
    %2 = vector.load %arg3[%c0_3, %c0_4] : memref<1x64xf32, #tpu.memory_space<vmem>>, vector<1x64xf32>
    %cst = arith.constant dense<0.000000e+00> : vector<16xf32>
    %3 = vector.multi_reduction <add>, %0, %cst [1] : vector<16x64xf32> to vector<16xf32>
    %4 = vector.shape_cast %3 : vector<16xf32> to vector<16x1xf32>
    %cst_5 = arith.constant 6.400000e+01 : f32
    %5 = vector.broadcast %cst_5 : f32 to vector<16x1xf32>
    %6 = arith.divf %4, %5 : vector<16x1xf32>
    %7 = vector.broadcast %6 : vector<16x1xf32> to vector<16x64xf32>
    %8 = arith.subf %0, %7 : vector<16x64xf32>
    %9 = vector.broadcast %6 : vector<16x1xf32> to vector<16x64xf32>
    %10 = arith.subf %0, %9 : vector<16x64xf32>
    %11 = arith.mulf %8, %10 : vector<16x64xf32>
    %cst_6 = arith.constant dense<0.000000e+00> : vector<16xf32>
    %12 = vector.multi_reduction <add>, %11, %cst_6 [1] : vector<16x64xf32> to vector<16xf32>
    %13 = vector.shape_cast %12 : vector<16xf32> to vector<16x1xf32>
    %cst_7 = arith.constant 6.400000e+01 : f32
    %14 = vector.broadcast %cst_7 : f32 to vector<16x1xf32>
    %15 = arith.divf %13, %14 : vector<16x1xf32>
    %16 = vector.broadcast %6 : vector<16x1xf32> to vector<16x64xf32>
    %17 = arith.subf %0, %16 : vector<16x64xf32>
    %cst_8 = arith.constant 9.99999996E-13 : f32
    %18 = vector.broadcast %cst_8 : f32 to vector<16x1xf32>
    %19 = arith.addf %15, %18 : vector<16x1xf32>
    %20 = math.rsqrt %19 : vector<16x1xf32>
    %21 = vector.broadcast %20 : vector<16x1xf32> to vector<16x64xf32>
    %22 = arith.mulf %17, %21 : vector<16x64xf32>
    %23 = vector.broadcast %1 : vector<1x64xf32> to vector<16x64xf32>
    %24 = arith.mulf %22, %23 : vector<16x64xf32>
    %25 = vector.broadcast %2 : vector<1x64xf32> to vector<16x64xf32>
    %26 = arith.addf %24, %25 : vector<16x64xf32>
    %27 = arith.truncf %26 : vector<16x64xf32> to vector<16x64xbf16>
    %c0_9 = arith.constant 0 : index
    %c0_10 = arith.constant 0 : index
    %28 = vector.load %arg4[%c0_9, %c0_10] : memref<16x64xbf16, #tpu.memory_space<vmem>>, vector<16x64xbf16>
    tpu.vector_store %arg4[%c0_9, %c0_10], %27 {strides = array<i32>} : memref<16x64xbf16, #tpu.memory_space<vmem>>, vector<16x64xbf16>,
    return
  }
  func.func @transform_0(%arg0: i32) -> (i32, i32) {
    %c0_i32 = arith.constant 0 : i32
    %c0_i32_0 = arith.constant 0 : i32
    return %arg0, %c0_i32 : i32, i32
  }
  func.func @transform_1(%arg0: i32) -> (i32, i32) {
    %c0_i32 = arith.constant 0 : i32
    %c0_i32_0 = arith.constant 0 : i32
    %c0_i32_1 = arith.constant 0 : i32
    return %c0_i32, %c0_i32_0 : i32, i32
  }
  func.func @transform_2(%arg0: i32) -> (i32, i32) {
    %c0_i32 = arith.constant 0 : i32
    %c0_i32_0 = arith.constant 0 : i32
    %c0_i32_1 = arith.constant 0 : i32
    return %c0_i32, %c0_i32_0 : i32, i32
  }
  func.func @transform_3(%arg0: i32) -> (i32, i32) {
    %c0_i32 = arith.constant 0 : i32
    %c0_i32_0 = arith.constant 0 : i32
    return %arg0, %c0_i32 : i32, i32
  }
}

module attributes {stable_mosaic.version = 11 : i64} {
  func.func @_layer_kernel(%arg0: i32, %arg1: memref<1x16x64xbf16, #tpu.memory_space<vmem>>, %arg2: memref<1x1x16xf32, #tpu.memory_space<vmem>>, %arg3: memref<64x192xbf16, #tpu.memory_space<vmem>>, %arg4: memref<1x192xf32, #tpu.memory_space<vmem>>, %arg5: memref<64x64xbf16, #tpu.memory_space<vmem>>, %arg6: memref<1x64xf32, #tpu.memory_space<vmem>>, %arg7: memref<1x64xf32, #tpu.memory_space<vmem>>, %arg8: memref<1x64xf32, #tpu.memory_space<vmem>>, %arg9: memref<64x256xbf16, #tpu.memory_space<vmem>>, %arg10: memref<1x256xf32, #tpu.memory_space<vmem>>, %arg11: memref<256x64xbf16, #tpu.memory_space<vmem>>, %arg12: memref<1x64xf32, #tpu.memory_space<vmem>>, %arg13: memref<1x64xf32, #tpu.memory_space<vmem>>, %arg14: memref<1x64xf32, #tpu.memory_space<vmem>>, %arg15: memref<1x16x64xbf16, #tpu.memory_space<vmem>>) attributes {dimension_semantics = [#tpu.dimension_semantics<parallel>], iteration_bounds = array<i64: 2>, scalar_prefetch = 0 : i64, scratch_operands = 0 : i64, tpu.core_type = #tpu.core_type<tc>, window_params = [{transform_indices = @transform_0, window_bounds = array<i64: 1, 16, 64>}, {transform_indices = @transform_1, window_bounds = array<i64: 1, 1, 16>}, {pipeline_mode = #tpu.pipeline_mode<synchronous>, transform_indices = @transform_2, window_bounds = array<i64: 64, 192>}, {pipeline_mode = #tpu.pipeline_mode<synchronous>, transform_indices = @transform_3, window_bounds = array<i64: 1, 192>}, {pipeline_mode = #tpu.pipeline_mode<synchronous>, transform_indices = @transform_4, window_bounds = array<i64: 64, 64>}, {pipeline_mode = #tpu.pipeline_mode<synchronous>, transform_indices = @transform_5, window_bounds = array<i64: 1, 64>}, {pipeline_mode = #tpu.pipeline_mode<synchronous>, transform_indices = @transform_6, window_bounds = array<i64: 1, 64>}, {pipeline_mode = #tpu.pipeline_mode<synchronous>, transform_indices = @transform_7, window_bounds = array<i64: 1, 64>}, {pipeline_mode = #tpu.pipeline_mode<synchronous>, transform_indices = @transform_8, window_bounds = array<i64: 64, 256>}, {pipeline_mode = #tpu.pipeline_mode<synchronous>, transform_indices = @transform_9, window_bounds = array<i64: 1, 256>}, {pipeline_mode = #tpu.pipeline_mode<synchronous>, transform_indices = @transform_10, window_bounds = array<i64: 256, 64>}, {pipeline_mode = #tpu.pipeline_mode<synchronous>, transform_indices = @transform_11, window_bounds = array<i64: 1, 64>}, {pipeline_mode = #tpu.pipeline_mode<synchronous>, transform_indices = @transform_12, window_bounds = array<i64: 1, 64>}, {pipeline_mode = #tpu.pipeline_mode<synchronous>, transform_indices = @transform_13, window_bounds = array<i64: 1, 64>}, {transform_indices = @transform_14, window_bounds = array<i64: 1, 16, 64>}]} {
    %c0 = arith.constant 0 : index
    %c0_0 = arith.constant 0 : index
    %c0_1 = arith.constant 0 : index
    %0 = vector.load %arg1[%c0, %c0_0, %c0_1] : memref<1x16x64xbf16, #tpu.memory_space<vmem>>, vector<1x16x64xbf16>
    %1 = vector.shape_cast %0 : vector<1x16x64xbf16> to vector<16x64xbf16>
    %c0_2 = arith.constant 0 : index
    %c0_3 = arith.constant 0 : index
    %c0_4 = arith.constant 0 : index
    %2 = vector.load %arg2[%c0_2, %c0_3, %c0_4] : memref<1x1x16xf32, #tpu.memory_space<vmem>>, vector<1x1x16xf32>
    %3 = vector.shape_cast %2 : vector<1x1x16xf32> to vector<1x16xf32>
    %c0_5 = arith.constant 0 : index
    %c0_6 = arith.constant 0 : index
    %4 = vector.load %arg3[%c0_5, %c0_6] : memref<64x192xbf16, #tpu.memory_space<vmem>>, vector<64x192xbf16>
    %cst = arith.constant dense<0.000000e+00> : vector<16x192xf32>
    %5 = tpu.matmul %1, %4, %cst {dimension_numbers = #tpu.dot_dimension_numbers<[1], [0], [0], [1], [0, 0, 1, 1], [], []>} : vector<16x64xbf16>, vector<64x192xbf16>, vector<16x192xf32> -> vector<16x192xf32>
    %c0_7 = arith.constant 0 : index
    %c0_8 = arith.constant 0 : index
    %6 = vector.load %arg4[%c0_7, %c0_8] : memref<1x192xf32, #tpu.memory_space<vmem>>, vector<1x192xf32>
    %7 = vector.broadcast %6 : vector<1x192xf32> to vector<16x192xf32>
    %8 = arith.addf %5, %7 : vector<16x192xf32>
    %9 = arith.truncf %8 : vector<16x192xf32> to vector<16x192xbf16>
    %10 = vector.extract_strided_slice %9 {offsets = [0, 0], sizes = [16, 16], strides = [1, 1]} : vector<16x192xbf16> to vector<16x16xbf16>
    %11 = vector.extract_strided_slice %9 {offsets = [0, 64], sizes = [16, 16], strides = [1, 1]} : vector<16x192xbf16> to vector<16x16xbf16>
    %12 = vector.extract_strided_slice %9 {offsets = [0, 128], sizes = [16, 16], strides = [1, 1]} : vector<16x192xbf16> to vector<16x16xbf16>
    %cst_9 = arith.constant dense<0.000000e+00> : vector<16x16xf32>
    %13 = tpu.matmul %10, %11, %cst_9 {dimension_numbers = #tpu.dot_dimension_numbers<[1], [1], [0], [0], [0, 0, 1, 0], [], []>} : vector<16x16xbf16>, vector<16x16xbf16>, vector<16x16xf32> -> vector<16x16xf32>
    %cst_10 = arith.constant 2.500000e-01 : f32
    %14 = vector.broadcast %cst_10 : f32 to vector<16x16xf32>
    %15 = arith.mulf %13, %14 : vector<16x16xf32>
    %16 = vector.broadcast %3 : vector<1x16xf32> to vector<16x16xf32>
    %17 = arith.addf %15, %16 : vector<16x16xf32>
    %cst_11 = arith.constant dense<0xFF800000> : vector<16xf32>
    %18 = vector.multi_reduction <maximumf>, %17, %cst_11 [1] : vector<16x16xf32> to vector<16xf32>
    %19 = vector.shape_cast %18 : vector<16xf32> to vector<16x1xf32>
    %20 = vector.broadcast %19 : vector<16x1xf32> to vector<16x16xf32>
    %21 = arith.subf %17, %20 : vector<16x16xf32>
    %22 = math.exp %21 : vector<16x16xf32>
    %cst_12 = arith.constant dense<0.000000e+00> : vector<16xf32>
    %23 = vector.multi_reduction <add>, %22, %cst_12 [1] : vector<16x16xf32> to vector<16xf32>
    %24 = vector.shape_cast %23 : vector<16xf32> to vector<16x1xf32>
    %25 = tpu.reciprocal %24 {approx = true} : vector<16x1xf32> -> vector<16x1xf32>
    %26 = vector.broadcast %25 : vector<16x1xf32> to vector<16x16xf32>
    %27 = arith.mulf %22, %26 : vector<16x16xf32>
    %28 = arith.truncf %27 : vector<16x16xf32> to vector<16x16xbf16>
    %cst_13 = arith.constant dense<0.000000e+00> : vector<16x16xf32>
    %29 = tpu.matmul %28, %12, %cst_13 {dimension_numbers = #tpu.dot_dimension_numbers<[1], [0], [0], [1], [0, 0, 1, 1], [], []>} : vector<16x16xbf16>, vector<16x16xbf16>, vector<16x16xf32> -> vector<16x16xf32>
    %30 = vector.extract_strided_slice %9 {offsets = [0, 16], sizes = [16, 16], strides = [1, 1]} : vector<16x192xbf16> to vector<16x16xbf16>
    %31 = vector.extract_strided_slice %9 {offsets = [0, 80], sizes = [16, 16], strides = [1, 1]} : vector<16x192xbf16> to vector<16x16xbf16>
    %32 = vector.extract_strided_slice %9 {offsets = [0, 144], sizes = [16, 16], strides = [1, 1]} : vector<16x192xbf16> to vector<16x16xbf16>
    %cst_14 = arith.constant dense<0.000000e+00> : vector<16x16xf32>
    %33 = tpu.matmul %30, %31, %cst_14 {dimension_numbers = #tpu.dot_dimension_numbers<[1], [1], [0], [0], [0, 0, 1, 0], [], []>} : vector<16x16xbf16>, vector<16x16xbf16>, vector<16x16xf32> -> vector<16x16xf32>
    %cst_15 = arith.constant 2.500000e-01 : f32
    %34 = vector.broadcast %cst_15 : f32 to vector<16x16xf32>
    %35 = arith.mulf %33, %34 : vector<16x16xf32>
    %36 = vector.broadcast %3 : vector<1x16xf32> to vector<16x16xf32>
    %37 = arith.addf %35, %36 : vector<16x16xf32>
    %cst_16 = arith.constant dense<0xFF800000> : vector<16xf32>
    %38 = vector.multi_reduction <maximumf>, %37, %cst_16 [1] : vector<16x16xf32> to vector<16xf32>
    %39 = vector.shape_cast %38 : vector<16xf32> to vector<16x1xf32>
    %40 = vector.broadcast %39 : vector<16x1xf32> to vector<16x16xf32>
    %41 = arith.subf %37, %40 : vector<16x16xf32>
    %42 = math.exp %41 : vector<16x16xf32>
    %cst_17 = arith.constant dense<0.000000e+00> : vector<16xf32>
    %43 = vector.multi_reduction <add>, %42, %cst_17 [1] : vector<16x16xf32> to vector<16xf32>
    %44 = vector.shape_cast %43 : vector<16xf32> to vector<16x1xf32>
    %45 = tpu.reciprocal %44 {approx = true} : vector<16x1xf32> -> vector<16x1xf32>
    %46 = vector.broadcast %45 : vector<16x1xf32> to vector<16x16xf32>
    %47 = arith.mulf %42, %46 : vector<16x16xf32>
    %48 = arith.truncf %47 : vector<16x16xf32> to vector<16x16xbf16>
    %cst_18 = arith.constant dense<0.000000e+00> : vector<16x16xf32>
    %49 = tpu.matmul %48, %32, %cst_18 {dimension_numbers = #tpu.dot_dimension_numbers<[1], [0], [0], [1], [0, 0, 1, 1], [], []>} : vector<16x16xbf16>, vector<16x16xbf16>, vector<16x16xf32> -> vector<16x16xf32>
    %50 = vector.extract_strided_slice %9 {offsets = [0, 32], sizes = [16, 16], strides = [1, 1]} : vector<16x192xbf16> to vector<16x16xbf16>
    %51 = vector.extract_strided_slice %9 {offsets = [0, 96], sizes = [16, 16], strides = [1, 1]} : vector<16x192xbf16> to vector<16x16xbf16>
    %52 = vector.extract_strided_slice %9 {offsets = [0, 160], sizes = [16, 16], strides = [1, 1]} : vector<16x192xbf16> to vector<16x16xbf16>
    %cst_19 = arith.constant dense<0.000000e+00> : vector<16x16xf32>
    %53 = tpu.matmul %50, %51, %cst_19 {dimension_numbers = #tpu.dot_dimension_numbers<[1], [1], [0], [0], [0, 0, 1, 0], [], []>} : vector<16x16xbf16>, vector<16x16xbf16>, vector<16x16xf32> -> vector<16x16xf32>
    %cst_20 = arith.constant 2.500000e-01 : f32
    %54 = vector.broadcast %cst_20 : f32 to vector<16x16xf32>
    %55 = arith.mulf %53, %54 : vector<16x16xf32>
    %56 = vector.broadcast %3 : vector<1x16xf32> to vector<16x16xf32>
    %57 = arith.addf %55, %56 : vector<16x16xf32>
    %cst_21 = arith.constant dense<0xFF800000> : vector<16xf32>
    %58 = vector.multi_reduction <maximumf>, %57, %cst_21 [1] : vector<16x16xf32> to vector<16xf32>
    %59 = vector.shape_cast %58 : vector<16xf32> to vector<16x1xf32>
    %60 = vector.broadcast %59 : vector<16x1xf32> to vector<16x16xf32>
    %61 = arith.subf %57, %60 : vector<16x16xf32>
    %62 = math.exp %61 : vector<16x16xf32>
    %cst_22 = arith.constant dense<0.000000e+00> : vector<16xf32>
    %63 = vector.multi_reduction <add>, %62, %cst_22 [1] : vector<16x16xf32> to vector<16xf32>
    %64 = vector.shape_cast %63 : vector<16xf32> to vector<16x1xf32>
    %65 = tpu.reciprocal %64 {approx = true} : vector<16x1xf32> -> vector<16x1xf32>
    %66 = vector.broadcast %65 : vector<16x1xf32> to vector<16x16xf32>
    %67 = arith.mulf %62, %66 : vector<16x16xf32>
    %68 = arith.truncf %67 : vector<16x16xf32> to vector<16x16xbf16>
    %cst_23 = arith.constant dense<0.000000e+00> : vector<16x16xf32>
    %69 = tpu.matmul %68, %52, %cst_23 {dimension_numbers = #tpu.dot_dimension_numbers<[1], [0], [0], [1], [0, 0, 1, 1], [], []>} : vector<16x16xbf16>, vector<16x16xbf16>, vector<16x16xf32> -> vector<16x16xf32>
    %70 = vector.extract_strided_slice %9 {offsets = [0, 48], sizes = [16, 16], strides = [1, 1]} : vector<16x192xbf16> to vector<16x16xbf16>
    %71 = vector.extract_strided_slice %9 {offsets = [0, 112], sizes = [16, 16], strides = [1, 1]} : vector<16x192xbf16> to vector<16x16xbf16>
    %72 = vector.extract_strided_slice %9 {offsets = [0, 176], sizes = [16, 16], strides = [1, 1]} : vector<16x192xbf16> to vector<16x16xbf16>
    %cst_24 = arith.constant dense<0.000000e+00> : vector<16x16xf32>
    %73 = tpu.matmul %70, %71, %cst_24 {dimension_numbers = #tpu.dot_dimension_numbers<[1], [1], [0], [0], [0, 0, 1, 0], [], []>} : vector<16x16xbf16>, vector<16x16xbf16>, vector<16x16xf32> -> vector<16x16xf32>
    %cst_25 = arith.constant 2.500000e-01 : f32
    %74 = vector.broadcast %cst_25 : f32 to vector<16x16xf32>
    %75 = arith.mulf %73, %74 : vector<16x16xf32>
    %76 = vector.broadcast %3 : vector<1x16xf32> to vector<16x16xf32>
    %77 = arith.addf %75, %76 : vector<16x16xf32>
    %cst_26 = arith.constant dense<0xFF800000> : vector<16xf32>
    %78 = vector.multi_reduction <maximumf>, %77, %cst_26 [1] : vector<16x16xf32> to vector<16xf32>
    %79 = vector.shape_cast %78 : vector<16xf32> to vector<16x1xf32>
    %80 = vector.broadcast %79 : vector<16x1xf32> to vector<16x16xf32>
    %81 = arith.subf %77, %80 : vector<16x16xf32>
    %82 = math.exp %81 : vector<16x16xf32>
    %cst_27 = arith.constant dense<0.000000e+00> : vector<16xf32>
    %83 = vector.multi_reduction <add>, %82, %cst_27 [1] : vector<16x16xf32> to vector<16xf32>
    %84 = vector.shape_cast %83 : vector<16xf32> to vector<16x1xf32>
    %85 = tpu.reciprocal %84 {approx = true} : vector<16x1xf32> -> vector<16x1xf32>
    %86 = vector.broadcast %85 : vector<16x1xf32> to vector<16x16xf32>
    %87 = arith.mulf %82, %86 : vector<16x16xf32>
    %88 = arith.truncf %87 : vector<16x16xf32> to vector<16x16xbf16>
    %cst_28 = arith.constant dense<0.000000e+00> : vector<16x16xf32>
    %89 = tpu.matmul %88, %72, %cst_28 {dimension_numbers = #tpu.dot_dimension_numbers<[1], [0], [0], [1], [0, 0, 1, 1], [], []>} : vector<16x16xbf16>, vector<16x16xbf16>, vector<16x16xf32> -> vector<16x16xf32>
    %90 = tpu.concatenate %29, %49, %69, %89 in 1 : vector<16x16xf32>, vector<16x16xf32>, vector<16x16xf32>, vector<16x16xf32> -> vector<16x64xf32>
    %91 = arith.truncf %90 : vector<16x64xf32> to vector<16x64xbf16>
    %c0_29 = arith.constant 0 : index
    %c0_30 = arith.constant 0 : index
    %92 = vector.load %arg5[%c0_29, %c0_30] : memref<64x64xbf16, #tpu.memory_space<vmem>>, vector<64x64xbf16>
    %cst_31 = arith.constant dense<0.000000e+00> : vector<16x64xf32>
    %93 = tpu.matmul %91, %92, %cst_31 {dimension_numbers = #tpu.dot_dimension_numbers<[1], [0], [0], [1], [0, 0, 1, 1], [], []>} : vector<16x64xbf16>, vector<64x64xbf16>, vector<16x64xf32> -> vector<16x64xf32>
    %c0_32 = arith.constant 0 : index
    %c0_33 = arith.constant 0 : index
    %94 = vector.load %arg6[%c0_32, %c0_33] : memref<1x64xf32, #tpu.memory_space<vmem>>, vector<1x64xf32>
    %95 = vector.broadcast %94 : vector<1x64xf32> to vector<16x64xf32>
    %96 = arith.addf %93, %95 : vector<16x64xf32>
    %97 = arith.extf %1 : vector<16x64xbf16> to vector<16x64xf32>
    %98 = arith.addf %96, %97 : vector<16x64xf32>
    %c0_34 = arith.constant 0 : index
    %c0_35 = arith.constant 0 : index
    %99 = vector.load %arg7[%c0_34, %c0_35] : memref<1x64xf32, #tpu.memory_space<vmem>>, vector<1x64xf32>
    %c0_36 = arith.constant 0 : index
    %c0_37 = arith.constant 0 : index
    %100 = vector.load %arg8[%c0_36, %c0_37] : memref<1x64xf32, #tpu.memory_space<vmem>>, vector<1x64xf32>
    %cst_38 = arith.constant dense<0.000000e+00> : vector<16xf32>
    %101 = vector.multi_reduction <add>, %98, %cst_38 [1] : vector<16x64xf32> to vector<16xf32>
    %102 = vector.shape_cast %101 : vector<16xf32> to vector<16x1xf32>
    %cst_39 = arith.constant 6.400000e+01 : f32
    %103 = vector.broadcast %cst_39 : f32 to vector<16x1xf32>
    %104 = arith.divf %102, %103 : vector<16x1xf32>
    %105 = vector.broadcast %104 : vector<16x1xf32> to vector<16x64xf32>
    %106 = arith.subf %98, %105 : vector<16x64xf32>
    %107 = vector.broadcast %104 : vector<16x1xf32> to vector<16x64xf32>
    %108 = arith.subf %98, %107 : vector<16x64xf32>
    %109 = arith.mulf %106, %108 : vector<16x64xf32>
    %cst_40 = arith.constant dense<0.000000e+00> : vector<16xf32>
    %110 = vector.multi_reduction <add>, %109, %cst_40 [1] : vector<16x64xf32> to vector<16xf32>
    %111 = vector.shape_cast %110 : vector<16xf32> to vector<16x1xf32>
    %cst_41 = arith.constant 6.400000e+01 : f32
    %112 = vector.broadcast %cst_41 : f32 to vector<16x1xf32>
    %113 = arith.divf %111, %112 : vector<16x1xf32>
    %114 = vector.broadcast %104 : vector<16x1xf32> to vector<16x64xf32>
    %115 = arith.subf %98, %114 : vector<16x64xf32>
    %cst_42 = arith.constant 9.99999996E-13 : f32
    %116 = vector.broadcast %cst_42 : f32 to vector<16x1xf32>
    %117 = arith.addf %113, %116 : vector<16x1xf32>
    %118 = math.rsqrt %117 : vector<16x1xf32>
    %119 = vector.broadcast %118 : vector<16x1xf32> to vector<16x64xf32>
    %120 = arith.mulf %115, %119 : vector<16x64xf32>
    %121 = vector.broadcast %99 : vector<1x64xf32> to vector<16x64xf32>
    %122 = arith.mulf %120, %121 : vector<16x64xf32>
    %123 = vector.broadcast %100 : vector<1x64xf32> to vector<16x64xf32>
    %124 = arith.addf %122, %123 : vector<16x64xf32>
    %125 = arith.truncf %124 : vector<16x64xf32> to vector<16x64xbf16>
    %c0_43 = arith.constant 0 : index
    %c0_44 = arith.constant 0 : index
    %126 = vector.load %arg9[%c0_43, %c0_44] : memref<64x256xbf16, #tpu.memory_space<vmem>>, vector<64x256xbf16>
    %cst_45 = arith.constant dense<0.000000e+00> : vector<16x256xf32>
    %127 = tpu.matmul %125, %126, %cst_45 {dimension_numbers = #tpu.dot_dimension_numbers<[1], [0], [0], [1], [0, 0, 1, 1], [], []>} : vector<16x64xbf16>, vector<64x256xbf16>, vector<16x256xf32> -> vector<16x256xf32>
    %c0_46 = arith.constant 0 : index
    %c0_47 = arith.constant 0 : index
    %128 = vector.load %arg10[%c0_46, %c0_47] : memref<1x256xf32, #tpu.memory_space<vmem>>, vector<1x256xf32>
    %129 = vector.broadcast %128 : vector<1x256xf32> to vector<16x256xf32>
    %130 = arith.addf %127, %129 : vector<16x256xf32>
    %131 = arith.mulf %130, %130 : vector<16x256xf32>
    %132 = arith.mulf %130, %131 : vector<16x256xf32>
    %cst_48 = arith.constant 4.471500e-02 : f32
    %133 = vector.broadcast %cst_48 : f32 to vector<16x256xf32>
    %134 = arith.mulf %133, %132 : vector<16x256xf32>
    %135 = arith.addf %130, %134 : vector<16x256xf32>
    %cst_49 = arith.constant 0.797884583 : f32
    %136 = vector.broadcast %cst_49 : f32 to vector<16x256xf32>
    %137 = arith.mulf %136, %135 : vector<16x256xf32>
    %138 = math.tanh %137 : vector<16x256xf32>
    %cst_50 = arith.constant 1.000000e+00 : f32
    %139 = vector.broadcast %cst_50 : f32 to vector<16x256xf32>
    %140 = arith.addf %139, %138 : vector<16x256xf32>
    %cst_51 = arith.constant 5.000000e-01 : f32
    %141 = vector.broadcast %cst_51 : f32 to vector<16x256xf32>
    %142 = arith.mulf %141, %140 : vector<16x256xf32>
    %143 = arith.mulf %130, %142 : vector<16x256xf32>
    %144 = arith.truncf %143 : vector<16x256xf32> to vector<16x256xbf16>
    %c0_52 = arith.constant 0 : index
    %c0_53 = arith.constant 0 : index
    %145 = vector.load %arg11[%c0_52, %c0_53] : memref<256x64xbf16, #tpu.memory_space<vmem>>, vector<256x64xbf16>
    %cst_54 = arith.constant dense<0.000000e+00> : vector<16x64xf32>
    %146 = tpu.matmul %144, %145, %cst_54 {dimension_numbers = #tpu.dot_dimension_numbers<[1], [0], [0], [1], [0, 0, 1, 1], [], []>} : vector<16x256xbf16>, vector<256x64xbf16>, vector<16x64xf32> -> vector<16x64xf32>
    %c0_55 = arith.constant 0 : index
    %c0_56 = arith.constant 0 : index
    %147 = vector.load %arg12[%c0_55, %c0_56] : memref<1x64xf32, #tpu.memory_space<vmem>>, vector<1x64xf32>
    %148 = vector.broadcast %147 : vector<1x64xf32> to vector<16x64xf32>
    %149 = arith.addf %146, %148 : vector<16x64xf32>
    %150 = arith.addf %149, %124 : vector<16x64xf32>
    %c0_57 = arith.constant 0 : index
    %c0_58 = arith.constant 0 : index
    %151 = vector.load %arg13[%c0_57, %c0_58] : memref<1x64xf32, #tpu.memory_space<vmem>>, vector<1x64xf32>
    %c0_59 = arith.constant 0 : index
    %c0_60 = arith.constant 0 : index
    %152 = vector.load %arg14[%c0_59, %c0_60] : memref<1x64xf32, #tpu.memory_space<vmem>>, vector<1x64xf32>
    %cst_61 = arith.constant dense<0.000000e+00> : vector<16xf32>
    %153 = vector.multi_reduction <add>, %150, %cst_61 [1] : vector<16x64xf32> to vector<16xf32>
    %154 = vector.shape_cast %153 : vector<16xf32> to vector<16x1xf32>
    %cst_62 = arith.constant 6.400000e+01 : f32
    %155 = vector.broadcast %cst_62 : f32 to vector<16x1xf32>
    %156 = arith.divf %154, %155 : vector<16x1xf32>
    %157 = vector.broadcast %156 : vector<16x1xf32> to vector<16x64xf32>
    %158 = arith.subf %150, %157 : vector<16x64xf32>
    %159 = vector.broadcast %156 : vector<16x1xf32> to vector<16x64xf32>
    %160 = arith.subf %150, %159 : vector<16x64xf32>
    %161 = arith.mulf %158, %160 : vector<16x64xf32>
    %cst_63 = arith.constant dense<0.000000e+00> : vector<16xf32>
    %162 = vector.multi_reduction <add>, %161, %cst_63 [1] : vector<16x64xf32> to vector<16xf32>
    %163 = vector.shape_cast %162 : vector<16xf32> to vector<16x1xf32>
    %cst_64 = arith.constant 6.400000e+01 : f32
    %164 = vector.broadcast %cst_64 : f32 to vector<16x1xf32>
    %165 = arith.divf %163, %164 : vector<16x1xf32>
    %166 = vector.broadcast %156 : vector<16x1xf32> to vector<16x64xf32>
    %167 = arith.subf %150, %166 : vector<16x64xf32>
    %cst_65 = arith.constant 9.99999996E-13 : f32
    %168 = vector.broadcast %cst_65 : f32 to vector<16x1xf32>
    %169 = arith.addf %165, %168 : vector<16x1xf32>
    %170 = math.rsqrt %169 : vector<16x1xf32>
    %171 = vector.broadcast %170 : vector<16x1xf32> to vector<16x64xf32>
    %172 = arith.mulf %167, %171 : vector<16x64xf32>
    %173 = vector.broadcast %151 : vector<1x64xf32> to vector<16x64xf32>
    %174 = arith.mulf %172, %173 : vector<16x64xf32>
    %175 = vector.broadcast %152 : vector<1x64xf32> to vector<16x64xf32>
    %176 = arith.addf %174, %175 : vector<16x64xf32>
    %177 = arith.truncf %176 : vector<16x64xf32> to vector<16x64xbf16>
    %c0_66 = arith.constant 0 : index
    %c0_67 = arith.constant 0 : index
    %c0_68 = arith.constant 0 : index
    %178 = vector.load %arg15[%c0_66, %c0_67, %c0_68] : memref<1x16x64xbf16, #tpu.memory_space<vmem>>, vector<1x16x64xbf16>
    %179 = vector.shape_cast %178 : vector<1x16x64xbf16> to vector<16x64xbf16>
    %180 = vector.shape_cast %177 : vector<16x64xbf16> to vector<1x16x64xbf16>
    tpu.vector_store %arg15[%c0_66, %c0_67, %c0_68], %180 {strides = array<i32>} : memref<1x16x64xbf16, #tpu.memory_space<vmem>>, vector<1x16x64xbf16>,
    return
  }
  func.func @transform_0(%arg0: i32) -> (i32, i32, i32) {
    %c0_i32 = arith.constant 0 : i32
    %c0_i32_0 = arith.constant 0 : i32
    %c0_i32_1 = arith.constant 0 : i32
    return %arg0, %c0_i32, %c0_i32_0 : i32, i32, i32
  }
  func.func @transform_1(%arg0: i32) -> (i32, i32, i32) {
    %c0_i32 = arith.constant 0 : i32
    %c0_i32_0 = arith.constant 0 : i32
    %c0_i32_1 = arith.constant 0 : i32
    return %arg0, %c0_i32, %c0_i32_0 : i32, i32, i32
  }
  func.func @transform_2(%arg0: i32) -> (i32, i32) {
    %c0_i32 = arith.constant 0 : i32
    %c0_i32_0 = arith.constant 0 : i32
    %c0_i32_1 = arith.constant 0 : i32
    return %c0_i32, %c0_i32_0 : i32, i32
  }
  func.func @transform_3(%arg0: i32) -> (i32, i32) {
    %c0_i32 = arith.constant 0 : i32
    %c0_i32_0 = arith.constant 0 : i32
    %c0_i32_1 = arith.constant 0 : i32
    return %c0_i32, %c0_i32_0 : i32, i32
  }
  func.func @transform_4(%arg0: i32) -> (i32, i32) {
    %c0_i32 = arith.constant 0 : i32
    %c0_i32_0 = arith.constant 0 : i32
    %c0_i32_1 = arith.constant 0 : i32
    return %c0_i32, %c0_i32_0 : i32, i32
  }
  func.func @transform_5(%arg0: i32) -> (i32, i32) {
    %c0_i32 = arith.constant 0 : i32
    %c0_i32_0 = arith.constant 0 : i32
    %c0_i32_1 = arith.constant 0 : i32
    return %c0_i32, %c0_i32_0 : i32, i32
  }
  func.func @transform_6(%arg0: i32) -> (i32, i32) {
    %c0_i32 = arith.constant 0 : i32
    %c0_i32_0 = arith.constant 0 : i32
    %c0_i32_1 = arith.constant 0 : i32
    return %c0_i32, %c0_i32_0 : i32, i32
  }
  func.func @transform_7(%arg0: i32) -> (i32, i32) {
    %c0_i32 = arith.constant 0 : i32
    %c0_i32_0 = arith.constant 0 : i32
    %c0_i32_1 = arith.constant 0 : i32
    return %c0_i32, %c0_i32_0 : i32, i32
  }
  func.func @transform_8(%arg0: i32) -> (i32, i32) {
    %c0_i32 = arith.constant 0 : i32
    %c0_i32_0 = arith.constant 0 : i32
    %c0_i32_1 = arith.constant 0 : i32
    return %c0_i32, %c0_i32_0 : i32, i32
  }
  func.func @transform_9(%arg0: i32) -> (i32, i32) {
    %c0_i32 = arith.constant 0 : i32
    %c0_i32_0 = arith.constant 0 : i32
    %c0_i32_1 = arith.constant 0 : i32
    return %c0_i32, %c0_i32_0 : i32, i32
  }
  func.func @transform_10(%arg0: i32) -> (i32, i32) {
    %c0_i32 = arith.constant 0 : i32
    %c0_i32_0 = arith.constant 0 : i32
    %c0_i32_1 = arith.constant 0 : i32
    return %c0_i32, %c0_i32_0 : i32, i32
  }
  func.func @transform_11(%arg0: i32) -> (i32, i32) {
    %c0_i32 = arith.constant 0 : i32
    %c0_i32_0 = arith.constant 0 : i32
    %c0_i32_1 = arith.constant 0 : i32
    return %c0_i32, %c0_i32_0 : i32, i32
  }
  func.func @transform_12(%arg0: i32) -> (i32, i32) {
    %c0_i32 = arith.constant 0 : i32
    %c0_i32_0 = arith.constant 0 : i32
    %c0_i32_1 = arith.constant 0 : i32
    return %c0_i32, %c0_i32_0 : i32, i32
  }
  func.func @transform_13(%arg0: i32) -> (i32, i32) {
    %c0_i32 = arith.constant 0 : i32
    %c0_i32_0 = arith.constant 0 : i32
    %c0_i32_1 = arith.constant 0 : i32
    return %c0_i32, %c0_i32_0 : i32, i32
  }
  func.func @transform_14(%arg0: i32) -> (i32, i32, i32) {
    %c0_i32 = arith.constant 0 : i32
    %c0_i32_0 = arith.constant 0 : i32
    %c0_i32_1 = arith.constant 0 : i32
    return %arg0, %c0_i32, %c0_i32_0 : i32, i32, i32
  }
}

</mosaic_0001>

<bundles_post_ra>
// kernel: bert_class_forward.3
= control target key start
LH: loop header
LB: loop body
LE: loop exit
PB: predicated region body
PF: predicated region fallthrough
CT: control target
= control target key end

     0   :  { %s346_s12 = smov 0   ;;  %s377_s0 = inlined_call_operand.vmem [shape: f32[32,64], index: 0, kind: input, shape index: {}]   ;;  %s378_s1 = inlined_call_operand.vmem [shape: f32[1,64], index: 1, kind: input, shape index: {}]   ;;  %s379_s2 = inlined_call_operand.vmem [shape: f32[1,64], index: 2, kind: input, shape index: {}]   ;;  %s380_s3 = inlined_call_operand.vmem [shape: bf16[32,64], index: 3, kind: output, shape index: {}]  }
   0x1 LB: > { %s289_s13 = sadd.s32 4294967295, %s324_s12   ;;  %p293_p0 = scmp.ge.s32.totalorder %s324_s12, 1  ;;  %s324_s12 = sphi %s346_s12, %s13_s12  }
   0x2   : > { %p138_p1 = scmp.lt.s32.totalorder %s324_s12, 3 }
   0x4   : > { %p139_p2 = pnand %p293_p0, %p138_p1 }
   0x5   : > { %s294_s14 = sshll.u32 (!%p139_p2), %s289_s13, 1 }
   0x6   : > { %142 = sbr.rel (%p139_p2) target bundleno = 330 (0x14a), region = 32  ;;  %p163_p3 = scmp.lt.s32.totalorder (!%p139_p2), %s294_s14, 3 }
   0xb   : > { %s382_s14 = smov (!%p163_p3, %s294_s14), 3  ;;  %vm178_vm0 = vcmask 523264   ;;  %v298_v21 = vld [vmem:[%s378_s1] ss:$0 sm:$0xff]  ;;  %vm230_vm1 = vcmask 519168  }
   0xc   : > { %s295_s15 = sshll.u32 %s382_s14, 3  ;;  %v299_v23 = vld [vmem:[%s379_s2] ss:$0 sm:$0xff]  ;;  %s297_s23 = sshll.u32 %s382_s14, 2 }
   0xd   : > { %s166_s18 = scalar_lea.vmem %s377_s0, %s295_s15  ;;  %s172_s26 = scalar_lea.vmem %s380_s3, %s297_s23 }
   0xe   : > { %v174_v0 = vld [vmem:[%s166_s18] sm:$0xff]  ;;  %v175_v1 = vld [vmem:[%s166_s18 + $0x8] sm:$0xff] }
   0xf   : > { %v179_v2 = vsel %vm178_vm0, %v174_v0, 0.0  ;;  %v182_v3 = vsel %vm178_vm0, %v175_v1, 0.0 }
  0x10   : > { %180 = vadd.xlane.f32.xlu0 %v179_v2 }
  0x14   : > { %183 = vadd.xlane.f32.xlu0 %v182_v3 }
  0x99   : > { %v181_v4 = vpop.xlane.xlu0 %180 }
  0x9a   : > { %v186_v5 = vmul.f32 0.015625, %v181_v4 }
  0x9c   : > { %v188_v6 = vsub.f32 %v174_v0, %v186_v5 }
  0x9d   : > { %v184_v7 = vpop.xlane.xlu0 %183 }
  0x9e   : > { %v187_v8 = vmul.f32 0.015625, %v184_v7  ;;  %v190_v9 = vmul.f32 %v188_v6, %v188_v6 }
  0xa0   : > { %v189_v10 = vsub.f32 %v175_v1, %v187_v8  ;;  %v192_v11 = vsel %vm178_vm0, %v190_v9, 0.0 }
  0xa1   : > { %193 = vadd.xlane.f32.xlu1 %v192_v11 }
  0xa2   : > { %v191_v12 = vmul.f32 %v189_v10, %v189_v10 }
  0xa4   : > { %v195_v13 = vsel %vm178_vm0, %v191_v12, 0.0 }
  0xa5   : > { %196 = vadd.xlane.f32.xlu1 %v195_v13 }
 0x12a   : > { %v194_v14 = vpop.xlane.xlu1 %193 }
 0x12b   : > { %v198_v15 = vmul.f32 0.015625, %v194_v14 }
 0x12d   : > { %v200_v16 = vadd.f32 1e-12, %v198_v15 }
 0x12e   : > { %v197_v17 = vpop.xlane.xlu1 %196 }
 0x12f   : > { %314 = vrsqrt.f32 %v200_v16  ;;  %v199_v18 = vmul.f32 0.015625, %v197_v17 }
 0x131   : > { %v201_v19 = vadd.f32 1e-12, %v199_v18 }
 0x133   : > { %316 = vrsqrt.f32 %v201_v19 }
 0x13c   : > { %v315_v20 = vpop.eup %314 }
 0x13d   : > { %v204_v22 = vmul.f32 %v315_v20, %v188_v6 }
 0x13f   : > { %v212_v24 = vmul.f32 %v298_v21, %v204_v22 }
 0x140   : > { %v317_v25 = vpop.eup %316 }
 0x141   : > { %v220_v26 = vadd.f32 %v299_v23, %v212_v24  ;;  %v205_v27 = vmul.f32 %v317_v25, %v189_v10 }
 0x143   : > { %v304_v28 = vpack.c.bf16 %v220_v26, %v220_v26  ;;  %v213_v29 = vmul.f32 %v298_v21, %v205_v27 }
 0x145   : > { %231 = vst.msk [vmem:[%s172_s26] sm:$0xf] %vm230_vm1, %v304_v28  ;;  %v221_v30 = vadd.f32 %v299_v23, %v213_v29 }
 0x147   : > { %v305_v31 = vpack.c.bf16 %v221_v30, %v221_v30 }
 0x149   : > { %232 = vst.msk [vmem:[%s172_s26 + $0x4] sm:$0xf] %vm230_vm1, %v305_v31 }
 0x14a PF: > { %s13_s12 = sadd.s32 1, %s324_s12  }
 0x14b   : > { %p10_p4 = scmp.ge.s32.totalorder %s13_s12, 4  }
 0x14d   :  { %12 = sbr.rel (!%p10_p4) target bundleno = 1 (0x1), region = 62 }

// kernel: bert_class_forward.4
= control target key start
LH: loop header
LB: loop body
LE: loop exit
PB: predicated region body
PF: predicated region fallthrough
CT: control target
= control target key end

     0   :  { %s2106_s29 = smov 0   ;;  %s2382_s0 = inlined_call_operand.vmem [shape: bf16[2,16,64], index: 0, kind: input, shape index: {}]   ;;  %s2383_s1 = inlined_call_operand.vmem [shape: f32[2,1,16], index: 1, kind: input, shape index: {}]   ;;  %s2384_s2 = inlined_call_operand.vmem [shape: bf16[64,192], index: 2, kind: input, shape index: {}]   ;;  %s2385_s3 = inlined_call_operand.vmem [shape: f32[1,192], index: 3, kind: input, shape index: {}]   ;;  %s2386_s4 = inlined_call_operand.vmem [shape: bf16[64,64], index: 4, kind: input, shape index: {}]   ;;  %s2387_s5 = inlined_call_operand.vmem [shape: f32[1,64], index: 5, kind: input, shape index: {}]   ;;  %s2388_s6 = inlined_call_operand.vmem [shape: f32[1,64], index: 6, kind: input, shape index: {}]   ;;  %s2389_s7 = inlined_call_operand.vmem [shape: f32[1,64], index: 7, kind: input, shape index: {}]   ;;  %s2390_s8 = inlined_call_operand.vmem [shape: bf16[64,256], index: 8, kind: input, shape index: {}]   ;;  %s2391_s9 = inlined_call_operand.vmem [shape: f32[1,256], index: 9, kind: input, shape index: {}]   ;;  %s2392_s10 = inlined_call_operand.vmem [shape: bf16[256,64], index: 10, kind: input, shape index: {}]   ;;  %s2393_s11 = inlined_call_operand.vmem [shape: f32[1,64], index: 11, kind: input, shape index: {}]   ;;  %s2394_s12 = inlined_call_operand.vmem [shape: f32[1,64], index: 12, kind: input, shape index: {}]   ;;  %s2395_s13 = inlined_call_operand.vmem [shape: f32[1,64], index: 13, kind: input, shape index: {}]   ;;  %s2396_s14 = inlined_call_operand.vmem [shape: bf16[2,16,64], index: 14, kind: output, shape index: {}]  }
   0x1 LB: > { %s1711_s30 = sadd.s32 4294967295, %s2019_s29   ;;  %p1715_p0 = scmp.ge.s32.totalorder %s2019_s29, 1  ;;  %s2019_s29 = sphi %s2106_s29, %s24_s29  }
   0x2   : > { %p420_p1 = scmp.lt.s32.totalorder %s2019_s29, 3 }
   0x4   : > { %p421_p2 = pnand %p1715_p0, %p420_p1 }
   0x5   : > { %p469_p3 = scmp.lt.s32.totalorder (!%p421_p2), %s1711_s30, 1  ;;  %s2024_s23 = smov (!%p421_p2), 112  }
   0x6   : > { %424 = sbr.rel (%p421_p2) target bundleno = 2512 (0x9d0), region = 76  ;;  %s2025_s24 = smov (!%p421_p2), 64  }
   0x7   : > { %s2026_s26 = smov (!%p421_p2), 32   ;;  %s2027_s27 = smov (!%p421_p2), 48  }
   0x8   : > { %s2028_s28 = smov (!%p421_p2), 16   ;;  %s2029_s15 = smov (!%p421_p2), 96  }
   0x9   : > { %s2030_s16 = smov (!%p421_p2), 80  }
   0xb   : > { %v1919_v0 = vld [vmem:[%s2384_s2 + $0x34] ss:$8 sps:$4 sm:$0xff]   ;;  %v1921_v1 = vld [vmem:[%s2384_s2 + $0x30] ss:$8 sps:$4 sm:$0xff]   ;;  %v2021_v2 = vmov 0   ;;  %s2398_s30 = smov (!%p469_p3, %s1711_s30), 1  ;;  %v496_v10 = vlaneseq }
   0xc   : > { %587 = vmatprep.mubr.bf16.mxu1 %v2021_v2  ;;  %563 = vmatprep.subr.bf16.mxu1 %v1919_v0  ;;  %v1922_v3 = vld [vmem:[%s2384_s2 + $0x24] ss:$8 sps:$4 sm:$0xff]   ;;  %v1924_v4 = vld [vmem:[%s2384_s2 + $0x20] ss:$8 sps:$4 sm:$0xff]   ;;  %v1925_v5 = vld [vmem:[%s2384_s2 + $0x14] ss:$8 sps:$4 sm:$0xff]   ;;  %s476_s19 = scalar_lea.vmem %s2383_s1, %s2398_s30 }
   0xd   : > { %564 = vmatpush1.bf16.msra.mxu1 %v1921_v1  ;;  %s1779_s25 = sshll.u32 %s2398_s30, 3  ;;  %v1927_v6 = vld [vmem:[%s2384_s2 + $0x10] ss:$8 sps:$4 sm:$0xff]   ;;  %v1928_v7 = vld [vmem:[%s2384_s2 + $0x4] ss:$8 sps:$4 sm:$0xff]   ;;  %vm551_vm0 = vcmask 523264  }
   0xe   : > { %565 = vmatprep.subr.bf16.mxu1 %v1922_v3  ;;  %s473_s18 = scalar_lea.vmem %s2382_s0, %s1779_s25  ;;  %v1930_v8 = vld [vmem:[%s2384_s2] ss:$8 sps:$4 sm:$0xff]   ;;  %v2151_v11 = vshrl.u32 %v496_v10, 7  ;;  %v2022_v12 = vmov 0.0   ;;  %vm2023_vm1 = vmmov 0   ;;  %vm603_vm2 = vcmask 130048  }
   0xf   : > { %v2147_v9 = vld [vmem:[%s473_s18] sm:$0xff]   ;;  %1838 = vmatprep.subr.bf16.mxu0 %v2022_v12  ;;  %1840 = vmatprep.mubr.msk.bf16.mxu0 %vm2023_vm1, %v2022_v12  ;;  %vm1130_vm3 = vcmask 261120   ;;  %vm1133_vm4 = vcmask 392192   ;;  %vm1644_vm5 = vcmask 519168  }
  0x10   : > { %v498_v13 = vsub.s32 0, %v2151_v11  ;;  %v494_v14 = vld [vmem:[%s2385_s3] sm:$0x3]  ;;  %v502_v22 = vsub.s32 1, %v2151_v11 }
  0x11   : > { %566 = vmatpush1.bf16.msra.mxu1 %v1924_v4  ;;  %v1731_v39 = vld [vmem:[%s476_s19] ss:$0 sm:$0xff] }
  0x12   : > { %567 = vmatprep.subr.bf16.mxu1 %v1925_v5  ;;  %v499_v16 = vrot.slane %v494_v14, %v498_v13  ;;  %v503_v26 = vrot.slane %v494_v14, %v502_v22 }
  0x15   : > { %568 = vmatpush1.bf16.msra.mxu1 %v1927_v6 }
  0x16   : > { %569 = vmatprep.subr.bf16.mxu1 %v1928_v7 }
  0x19   : > { %570 = vmatpush1.bf16.msra.mxu1 %v1930_v8 }
  0x1a   : > { %1826 = vmatprep.subr.bf16.mxu1 %v2022_v12 }
  0x1c   : > { %1729 = vmatmul.mubr.msk.bf16.vlgmr.msra.gmra.mxu1 %vm551_vm0, %v2147_v9 }
  0x1d   : > { %1828 = vmatprep.mubr.msk.bf16.mxu1 %vm2023_vm1, %v2022_v12 }
  0xdc   : > { %v589_v15 = vpop.f32.mrf.mxu1 }
  0xdd   : > { %v590_v19 = vadd.f32 %v589_v15, %v499_v16 }
  0xde   : > { %v591_v17 = vpop.f32.mrf.mxu1 }
  0xdf   : > { %v592_v31 = vadd.f32 %v591_v17, %v503_v26 }
  0xe0   : > { %v593_v18 = vpop.f32.mrf.mxu1 }
  0xe1   : > { %v594_v20 = vadd.f32 %v593_v18, %v499_v16 }
  0xe2   : > { %v595_v24 = vpop.f32.mrf.mxu1 }
  0xe3   : > { %v598_v21 = vpack.c.bf16 %v594_v20, %v590_v19  ;;  %v596_v27 = vadd.f32 %v595_v24, %v503_v26 }
  0xe5   : > { %728 = vrot.lane.b32.xlu1 %v598_v21, %s2024_s23  ;;  %601 = vrot.lane.b32.xlu0 %v598_v21, %s2025_s24  ;;  %v2178_v32 = vpack.c.bf16 %v596_v27, %v592_v31 }
  0xe9   : > { %856 = vrot.lane.b32.xlu1 %v598_v21, %s2026_s26  ;;  %730 = vrot.lane.b32.xlu0 %v598_v21, %s2027_s27 }
  0xed   : > { %981 = vrot.lane.b32.xlu1 %v598_v21, %s2028_s28  ;;  %854 = vrot.lane.b32.xlu0 %v598_v21, %s2029_s15 }
  0xf1   : > { %979 = vrot.lane.b32.xlu0 %v598_v21, %s2030_s16 }
 0x157   : > { %v602_v23 = vpop.permute.xlu0 %601  ;;  %v729_v28 = vpop.permute.xlu1 %728 }
 0x158   : > { %v608_v25 = vsel %vm603_vm2, %v602_v23, 0 }
 0x159   : > { %1827 = vmatpush3.bf16.xpose.msra.mxu1 %v608_v25 }
 0x15a   : > { %1832 = vmatprep.subr.bf16.mxu1 %v2022_v12 }
 0x15b   : > { %v731_v29 = vpop.permute.xlu0 %730  ;;  %v857_v33 = vpop.permute.xlu1 %856 }
 0x15c   : > { %v736_v30 = vsel %vm603_vm2, %v731_v29, 0  ;;  %v862_v34 = vsel %vm603_vm2, %v857_v33, 0 }
 0x15d   : > { %1839 = vmatpush3.bf16.xpose.msra.mxu0 %v736_v30 }
 0x15e   : > { %1850 = vmatprep.subr.bf16.mxu0 %v2022_v12 }
 0x15f   : > { %v982_v35 = vpop.permute.xlu1 %981  ;;  %v855_v36 = vpop.permute.xlu0 %854 }
 0x160   : > { %1829 = vmatmul.mubr.msk.bf16.vlgmr.msra.gmra.mxu1 %vm603_vm2, %v598_v21  ;;  %v987_v37 = vsel %vm603_vm2, %v982_v35, 0 }
 0x161   : > { %1833 = vmatpush3.bf16.msra.mxu1 %v2178_v32  ;;  %1834 = vmatprep.mubr.msk.bf16.mxu1 %vm2023_vm1, %v2022_v12 }
 0x162   : > { %1844 = vmatprep.subr.bf16.mxu1 %v2022_v12 }
 0x163   : > { %v980_v38 = vpop.permute.xlu0 %979 }
 0x164   : > { %1841 = vmatmul.mubr.msk.bf16.vlgmr.msra.gmra.mxu0 %vm603_vm2, %v729_v28 }
 0x165   : > { %1851 = vmatpush3.bf16.xpose.msra.mxu0 %v862_v34  ;;  %1852 = vmatprep.mubr.msk.bf16.mxu0 %vm2023_vm1, %v2022_v12 }
 0x166   : > { %1862 = vmatprep.subr.bf16.mxu0 %v2022_v12 }
 0x16c   : > { %1853 = vmatmul.mubr.msk.bf16.vlgmr.msra.gmra.mxu0 %vm603_vm2, %v855_v36 }
 0x16d   : > { %1863 = vmatpush3.bf16.xpose.msra.mxu0 %v987_v37  ;;  %1864 = vmatprep.mubr.msk.bf16.mxu0 %vm2023_vm1, %v2022_v12 }
 0x16e   : > { %1874 = vmatprep.subr.bf16.mxu0 %v2022_v12 }
 0x174   : > { %1865 = vmatmul.mubr.msk.bf16.vlgmr.msra.gmra.mxu0 %vm603_vm2, %v980_v38 }
 0x175   : > { %1882 = vmatprep.mubr.msk.bf16.mxu0 %vm2023_vm1, %v2022_v12 }
 0x220   : > { %v644_v40 = vpop.f32.mrf.mxu1 }
 0x221   : > { %v651_v41 = vmul.f32 0.25, %v644_v40 }
 0x222   : > { %v1830_v42 = vpop.f32.mrf.mxu1 }
 0x223   : > { %v659_v43 = vadd.f32 %v1731_v39, %v651_v41 }
 0x224   : > { %v647_v44 = vpop.f32.mrf.mxu1  ;;  %v772_v45 = vpop.f32.mrf.mxu0 }
 0x225   : > { %v652_v46 = vmul.f32 0.25, %v647_v44  ;;  %v779_v47 = vmul.f32 0.25, %v772_v45  ;;  %v661_v48 = vsel %vm603_vm2, %v659_v43, -inf }
 0x226   : > { %662 = vmax.xlane.f32.xlu1 %v661_v48  ;;  %v1831_v49 = vpop.f32.mrf.mxu1  ;;  %v1842_v50 = vpop.f32.mrf.mxu0 }
 0x227   : > { %v660_v51 = vadd.f32 %v1731_v39, %v652_v46  ;;  %v781_v55 = vadd.f32 %v1731_v39, %v779_v47 }
 0x228   : > { %v775_v52 = vpop.f32.mrf.mxu0 }
 0x229   : > { %v780_v53 = vmul.f32 0.25, %v775_v52  ;;  %v664_v54 = vsel %vm603_vm2, %v660_v51, -inf  ;;  %v783_v60 = vsel %vm603_vm2, %v781_v55, -inf }
 0x22a   : > { %665 = vmax.xlane.f32.xlu0 %v664_v54  ;;  %v1843_v56 = vpop.f32.mrf.mxu0 }
 0x22b   : > { %v782_v57 = vadd.f32 %v1731_v39, %v780_v53 }
 0x22c   : > { %v898_v58 = vpop.f32.mrf.mxu0 }
 0x22d   : > { %v905_v59 = vmul.f32 0.25, %v898_v58  ;;  %v786_v61 = vsel %vm603_vm2, %v782_v57, -inf }
 0x22e   : > { %784 = vmax.xlane.f32.xlu0 %v783_v60  ;;  %787 = vmax.xlane.f32.xlu1 %v786_v61  ;;  %v1854_v62 = vpop.f32.mrf.mxu0 }
 0x22f   : > { %v907_v63 = vadd.f32 %v1731_v39, %v905_v59 }
 0x230   : > { %v901_v0 = vpop.f32.mrf.mxu0 }
 0x231   : > { %v906_v1 = vmul.f32 0.25, %v901_v0  ;;  %v909_v3 = vsel %vm603_vm2, %v907_v63, -inf }
 0x232   : > { %910 = vmax.xlane.f32.xlu0 %v909_v3  ;;  %v1855_v4 = vpop.f32.mrf.mxu0 }
 0x233   : > { %v908_v5 = vadd.f32 %v1731_v39, %v906_v1 }
 0x234   : > { %v1023_v6 = vpop.f32.mrf.mxu0 }
 0x235   : > { %v1030_v7 = vmul.f32 0.25, %v1023_v6  ;;  %v912_v8 = vsel %vm603_vm2, %v908_v5, -inf }
 0x236   : > { %913 = vmax.xlane.f32.xlu1 %v912_v8  ;;  %v1866_v10 = vpop.f32.mrf.mxu0 }
 0x237   : > { %v1032_v14 = vadd.f32 %v1731_v39, %v1030_v7 }
 0x238   : > { %v1026_v15 = vpop.f32.mrf.mxu0 }
 0x239   : > { %v1031_v16 = vmul.f32 0.25, %v1026_v15  ;;  %v1034_v17 = vsel %vm603_vm2, %v1032_v14, -inf }
 0x23a   : > { %1035 = vmax.xlane.f32.xlu0 %v1034_v17  ;;  %v1867_v18 = vpop.f32.mrf.mxu0 }
 0x23b   : > { %v1033_v19 = vadd.f32 %v1731_v39, %v1031_v16 }
 0x23d   : > { %v1037_v20 = vsel %vm603_vm2, %v1033_v19, -inf }
 0x23e   : > { %1038 = vmax.xlane.f32.xlu1 %v1037_v20 }
 0x2af   : > { %v663_v21 = vpop.xlane.xlu1 %662 }
 0x2b0   : > { %v667_v23 = vsub.f32 %v659_v43, %v663_v21 }
 0x2b2   : > { %v669_v24 = vmul.f32 1.442695, %v667_v23 }
 0x2b3   : > { %v666_v25 = vpop.xlane.xlu0 %665 }
 0x2b4   : > { %1965 = vpow2.f32 %v669_v24  ;;  %v668_v26 = vsub.f32 %v660_v51, %v666_v25 }
 0x2b6   : > { %v671_v27 = vmul.f32 1.442695, %v668_v26 }
 0x2b7   : > { %v788_v28 = vpop.xlane.xlu1 %787  ;;  %v785_v29 = vpop.xlane.xlu0 %784 }
 0x2b8   : > { %1967 = vpow2.f32 %v671_v27  ;;  %v790_v30 = vsub.f32 %v782_v57, %v788_v28  ;;  %v789_v31 = vsub.f32 %v781_v55, %v785_v29 }
 0x2ba   : > { %v793_v33 = vmul.f32 1.442695, %v790_v30  ;;  %v791_v34 = vmul.f32 1.442695, %v789_v31 }
 0x2bb   : > { %v911_v35 = vpop.xlane.xlu0 %910 }
 0x2bc   : > { %1969 = vpow2.f32 %v793_v33  ;;  %v915_v36 = vsub.f32 %v907_v63, %v911_v35 }
 0x2bd   : > { %1971 = vpow2.f32 %v791_v34 }
 0x2be   : > { %v917_v37 = vmul.f32 1.442695, %v915_v36 }
 0x2bf   : > { %v914_v38 = vpop.xlane.xlu1 %913 }
 0x2c0   : > { %1973 = vpow2.f32 %v917_v37  ;;  %v916_v39 = vsub.f32 %v908_v5, %v914_v38 }
 0x2c1   : > { %v1966_v40 = vpop.eup %1965 }
 0x2c2   : > { %v919_v41 = vmul.f32 1.442695, %v916_v39  ;;  %v673_v42 = vsel %vm603_vm2, %v1966_v40, 0.0 }
 0x2c3   : > { %674 = vadd.xlane.f32.xlu0 %v673_v42  ;;  %v1036_v43 = vpop.xlane.xlu0 %1035 }
 0x2c4   : > { %1975 = vpow2.f32 %v919_v41  ;;  %v1040_v44 = vsub.f32 %v1032_v14, %v1036_v43  ;;  %v1932_v43 = vld [vmem:[%s2386_s4 + $0x18] sm:$0xff]  }
 0x2c5   : > { %v1968_v45 = vpop.eup %1967  ;;  %1875 = vmatpush3.bf16.msra.mxu0 %v1932_v43  ;;  %v1947_v43 = vld [vmem:[%s2390_s8 + $0x4] ss:$8 sps:$4 sm:$0xff]  }
 0x2c6   : > { %v1042_v46 = vmul.f32 1.442695, %v1040_v44  ;;  %v676_v47 = vsel %vm603_vm2, %v1968_v45, 0.0  ;;  %1876 = vmatprep.subr.bf16.mxu0 %v2022_v12 }
 0x2c7   : > { %677 = vadd.xlane.f32.xlu1 %v676_v47  ;;  %v1039_v58 = vpop.xlane.xlu1 %1038 }
 0x2c8   : > { %1977 = vpow2.f32 %v1042_v46  ;;  %v1041_v59 = vsub.f32 %v1033_v19, %v1039_v58  ;;  %v1933_v46 = vld [vmem:[%s2386_s4 + $0x10] sm:$0xff]  }
 0x2c9   : > { %v1970_v48 = vpop.eup %1969  ;;  %1877 = vmatpush3.bf16.msra.mxu0 %v1933_v46 }
 0x2ca   : > { %v1972_v49 = vpop.eup %1971  ;;  %v798_v50 = vsel %vm603_vm2, %v1970_v48, 0.0  ;;  %v1044_v60 = vmul.f32 1.442695, %v1041_v59  ;;  %1878 = vmatprep.subr.bf16.mxu0 %v2022_v12 }
 0x2cb   : > { %799 = vadd.xlane.f32.xlu1 %v798_v50  ;;  %v795_v51 = vsel %vm603_vm2, %v1972_v49, 0.0 }
 0x2cc   : > { %796 = vadd.xlane.f32.xlu0 %v795_v51  ;;  %1979 = vpow2.f32 %v1044_v60 }
 0x2cd   : > { %v1974_v52 = vpop.eup %1973 }
 0x2ce   : > { %v921_v53 = vsel %vm603_vm2, %v1974_v52, 0.0 }
 0x2d0   : > { %922 = vadd.xlane.f32.xlu0 %v921_v53 }
 0x2d1   : > { %v1976_v54 = vpop.eup %1975 }
 0x2d2   : > { %v924_v55 = vsel %vm603_vm2, %v1976_v54, 0.0 }
 0x2d3   : > { %925 = vadd.xlane.f32.xlu1 %v924_v55 }
 0x2d5   : > { %v1978_v56 = vpop.eup %1977 }
 0x2d6   : > { %v1046_v57 = vsel %vm603_vm2, %v1978_v56, 0.0 }
 0x2d7   : > { %1047 = vadd.xlane.f32.xlu0 %v1046_v57 }
 0x2d9   : > { %v1980_v61 = vpop.eup %1979 }
 0x2da   : > { %v1049_v62 = vsel %vm603_vm2, %v1980_v61, 0.0 }
 0x2e4   : > { %932 = vrot.lane.b32.xlu1 %v2178_v32, %s2029_s15 }
 0x2ed   : > { %807 = vrot.lane.b32.xlu0 %v2178_v32, %s2024_s23 }
 0x308   : > { %1050 = vadd.xlane.f32.xlu1 %v1049_v62 }
 0x319   : > { %1057 = vrot.lane.b32.xlu1 %v2178_v32, %s2030_s16  ;;  %s481_s16 = scalar_lea.vmem %s2396_s14, %s1779_s25 }
 0x34c   : > { %v675_v63 = vpop.xlane.xlu0 %674 }
 0x34d   : > { %1981 = vrcp.f32 %v675_v63 }
 0x350   : > { %v678_v0 = vpop.xlane.xlu1 %677 }
 0x351   : > { %1983 = vrcp.f32 %v678_v0 }
 0x354   : > { %v800_v1 = vpop.xlane.xlu1 %799 }
 0x355   : > { %1985 = vrcp.f32 %v800_v1  ;;  %v797_v3 = vpop.xlane.xlu0 %796 }
 0x356   : > { %1987 = vrcp.f32 %v797_v3 }
 0x359   : > { %v923_v5 = vpop.xlane.xlu0 %922 }
 0x35a   : > { %v1982_v4 = vpop.eup %1981 }
 0x35b   : > { %v681_v8 = vmul.f32 %v1982_v4, %v1966_v40 }
 0x35c   : > { %v926_v6 = vpop.xlane.xlu1 %925 }
 0x35d   : > { %1989 = vrcp.f32 %v926_v6 }
 0x35e   : > { %v1984_v7 = vpop.eup %1983  ;;  %1991 = vrcp.f32 %v923_v5 }
 0x35f   : > { %v682_v10 = vmul.f32 %v1984_v7, %v1968_v45 }
 0x360   : > { %v1048_v14 = vpop.xlane.xlu0 %1047  ;;  %v933_v23 = vpop.permute.xlu1 %932 }
 0x361   : > { %v683_v15 = vpack.c.bf16 %v682_v10, %v681_v8  ;;  %1993 = vrcp.f32 %v1048_v14  ;;  %v1739_v14 = vld [vmem:[%s2387_s5] ss:$0 sm:$0xff] }
 0x362   : > { %v1986_v16 = vpop.eup %1985 }
 0x363   : > { %v1988_v32 = vpop.eup %1987  ;;  %1835 = vmatmul.mubr.msk.bf16.vlgmr.msra.gmra.mxu1 %vm603_vm2, %v683_v15  ;;  %v804_v19 = vmul.f32 %v1986_v16, %v1970_v48  ;;  %v1934_v48 = vld [vmem:[%s2386_s4 + $0x8] sm:$0xff]   ;;  %v1220_v15 = vunpack.c.l.bf16 %v2147_v9 }
 0x364   : > { %v808_v17 = vpop.permute.xlu0 %807  ;;  %1846 = vmatprep.mubr.msk.bf16.mxu1 %vm2023_vm1, %v2022_v12  ;;  %v803_v18 = vmul.f32 %v1988_v32, %v1972_v49  ;;  %1879 = vmatpush3.bf16.msra.mxu0 %v1934_v48 }
 0x365   : > { %1845 = vmatpush3.bf16.msra.mxu1 %v808_v17  ;;  %1880 = vmatprep.subr.bf16.mxu0 %v2022_v12 }
 0x366   : > { %1856 = vmatprep.subr.bf16.mxu1 %v2022_v12  ;;  %v805_v20 = vpack.c.bf16 %v804_v19, %v803_v18  ;;  %v1221_v19 = vunpack.c.h.bf16 %v2147_v9 }
 0x36a   : > { %v1990_v21 = vpop.eup %1989 }
 0x36b   : > { %1847 = vmatmul.mubr.msk.bf16.vlgmr.msra.gmra.mxu1 %vm603_vm2, %v805_v20  ;;  %v1992_v24 = vpop.eup %1991  ;;  %v930_v25 = vmul.f32 %v1990_v21, %v1976_v54 }
 0x36c   : > { %1857 = vmatpush3.bf16.msra.mxu1 %v933_v23  ;;  %1858 = vmatprep.mubr.msk.bf16.mxu1 %vm2023_vm1, %v2022_v12  ;;  %v929_v26 = vmul.f32 %v1992_v24, %v1974_v52  ;;  %v1935_v52 = vld [vmem:[%s2386_s4] sm:$0xff]  }
 0x36d   : > { %1868 = vmatprep.subr.bf16.mxu1 %v2022_v12  ;;  %1881 = vmatpush3.bf16.msra.mxu0 %v1935_v52  ;;  %v1745_v52 = vld [vmem:[%s2388_s6] ss:$0 sm:$0xff] }
 0x36e   : > { %v931_v27 = vpack.c.bf16 %v930_v25, %v929_v26  ;;  %v1994_v30 = vpop.eup %1993 }
 0x36f   : > { %v1054_v33 = vmul.f32 %v1994_v30, %v1978_v56 }
 0x373   : > { %1859 = vmatmul.mubr.msk.bf16.vlgmr.msra.gmra.mxu1 %vm603_vm2, %v931_v27 }
 0x374   : > { %1870 = vmatprep.mubr.msk.bf16.mxu1 %vm2023_vm1, %v2022_v12 }
 0x391   : > { %v1051_v28 = vpop.xlane.xlu1 %1050 }
 0x392   : > { %1995 = vrcp.f32 %v1051_v28 }
 0x395   : > { %v1058_v29 = vpop.permute.xlu1 %1057 }
 0x396   : > { %1869 = vmatpush3.bf16.msra.mxu1 %v1058_v29 }
 0x39f   : > { %v1996_v31 = vpop.eup %1995 }
 0x3a0   : > { %v1055_v34 = vmul.f32 %v1996_v31, %v1980_v61 }
 0x3a2   : > { %v1056_v35 = vpack.c.bf16 %v1055_v34, %v1054_v33 }
 0x3a4   : > { %1871 = vmatmul.mubr.msk.bf16.vlgmr.msra.gmra.mxu1 %vm603_vm2, %v1056_v35 }
 0x3a5   : > { %1365 = vmatprep.mubr.bf16.mxu1 %v2021_v2 }
 0x423   : > { %v721_v36 = vpop.f32.mrf.mxu1 }
 0x425   : > { %v1836_v37 = vpop.f32.mrf.mxu1 }
 0x426   : > { %v1938_v37 = vld [vmem:[%s2390_s8 + $0x34] ss:$8 sps:$4 sm:$0xff]  }
 0x427   : > { %v724_v38 = vpop.f32.mrf.mxu1  ;;  %1341 = vmatprep.subr.bf16.mxu1 %v1938_v37 }
 0x429   : > { %v1837_v39 = vpop.f32.mrf.mxu1 }
 0x42a   : > { %v1941_v39 = vld [vmem:[%s2390_s8 + $0x24] ss:$8 sps:$4 sm:$0xff]  }
 0x42b   : > { %v847_v40 = vpop.f32.mrf.mxu1 }
 0x42d   : > { %v1848_v41 = vpop.f32.mrf.mxu1 }
 0x42e   : > { %v1944_v41 = vld [vmem:[%s2390_s8 + $0x14] ss:$8 sps:$4 sm:$0xff]  }
 0x42f   : > { %v850_v42 = vpop.f32.mrf.mxu1 }
 0x430   : > { %v1904_v44 = vpack.i.bf16 %v850_v42, %v847_v40  ;;  %v1939_v40 = vld [vmem:[%s2390_s8 + $0x20] ss:$8 sps:$4 sm:$0xff]   ;;  %v1942_v42 = vld [vmem:[%s2390_s8 + $0x10] ss:$8 sps:$4 sm:$0xff]  }
 0x431   : > { %v1849_v45 = vpop.f32.mrf.mxu1 }
 0x432   : > { %1905 = vrot.lane.b32.xlu0 %v1904_v44, %s2028_s28  ;;  %v1945_v44 = vld [vmem:[%s2390_s8] ss:$8 sps:$4 sm:$0xff]  }
 0x433   : > { %v972_v2 = vpop.f32.mrf.mxu1 }
 0x435   : > { %v1860_v47 = vpop.f32.mrf.mxu1 }
 0x437   : > { %v975_v49 = vpop.f32.mrf.mxu1 }
 0x438   : > { %v1909_v50 = vpack.i.bf16 %v975_v49, %v972_v2 }
 0x439   : > { %v1861_v51 = vpop.f32.mrf.mxu1 }
 0x43a   : > { %1910 = vrot.lane.b32.xlu1 %v1909_v50, %s2026_s26 }
 0x464   : > { %v1097_v53 = vpop.f32.mrf.mxu1 }
 0x466   : > { %v1872_v54 = vpop.f32.mrf.mxu1 }
 0x468   : > { %v1100_v55 = vpop.f32.mrf.mxu1 }
 0x469   : > { %v1914_v56 = vpack.i.bf16 %v1100_v55, %v1097_v53 }
 0x46a   : > { %v1873_v57 = vpop.f32.mrf.mxu1 }
 0x46b   : > { %1915 = vrot.lane.b32.xlu0 %v1914_v56, %s2027_s27  ;;  %v1746_v56 = vld [vmem:[%s2389_s7] ss:$0 sm:$0xff] }
 0x4a4   : > { %v1906_v58 = vpop.permute.xlu0 %1905 }
 0x4a5   : > { %v1908_v60 = vunpack.i.h.bf16 %v1906_v58  ;;  %v1907_v61 = vunpack.i.l.bf16 %v1906_v58 }
 0x4a7   : > { %v1129_v0 = vsel %vm603_vm2, %v724_v38, %v1908_v60  ;;  %v1128_v1 = vsel %vm603_vm2, %v721_v36, %v1907_v61  ;;  %v1936_v38 = vld [vmem:[%s2390_s8 + $0x30] ss:$8 sps:$4 sm:$0xff]  }
 0x4a8   : > { %1342 = vmatpush1.bf16.msra.mxu1 %v1936_v38  ;;  %v1948_v61 = vld [vmem:[%s2392_s10 + $0x78] sm:$0xff]  }
 0x4a9   : > { %1343 = vmatprep.subr.bf16.mxu1 %v1941_v39  ;;  %1804 = vmatprep.subr.bf16.mxu0 %v1948_v61 }
 0x4ac   : > { %v1911_v59 = vpop.permute.xlu1 %1910  ;;  %1344 = vmatpush1.bf16.msra.mxu1 %v1939_v40 }
 0x4ad   : > { %v1913_v62 = vunpack.i.h.bf16 %v1911_v59  ;;  %v1912_v63 = vunpack.i.l.bf16 %v1911_v59  ;;  %1345 = vmatprep.subr.bf16.mxu1 %v1944_v41 }
 0x4af   : > { %v1132_v5 = vsel %vm1130_vm3, %v1129_v0, %v1913_v62  ;;  %v1131_v6 = vsel %vm1130_vm3, %v1128_v1, %v1912_v63  ;;  %v1949_v62 = vld [vmem:[%s2392_s10 + $0x38] sm:$0xff]   ;;  %v1950_v63 = vld [vmem:[%s2392_s10 + $0x70] sm:$0xff]   ;;  %v1952_v0 = vld [vmem:[%s2392_s10 + $0x68] sm:$0xff]  }
 0x4b0   : > { %1346 = vmatpush1.bf16.msra.mxu1 %v1942_v42  ;;  %v1953_v1 = vld [vmem:[%s2392_s10 + $0x28] sm:$0xff]  }
 0x4b1   : > { %1347 = vmatprep.subr.bf16.mxu1 %v1947_v43 }
 0x4b4   : > { %1348 = vmatpush1.bf16.msra.mxu1 %v1945_v44 }
 0x4dd   : > { %v1916_v12 = vpop.permute.xlu0 %1915 }
 0x4de   : > { %v1918_v3 = vunpack.i.h.bf16 %v1916_v12  ;;  %v1917_v4 = vunpack.i.l.bf16 %v1916_v12  ;;  %v1951_v12 = vld [vmem:[%s2392_s10 + $0x30] sm:$0xff]  }
 0x4e0   : > { %v1135_v7 = vsel %vm1133_vm4, %v1132_v5, %v1918_v3  ;;  %v1134_v8 = vsel %vm1133_vm4, %v1131_v6, %v1917_v4  ;;  %v1954_v3 = vld [vmem:[%s2392_s10 + $0x60] sm:$0xff]   ;;  %v1956_v5 = vld [vmem:[%s2392_s10 + $0x58] sm:$0xff]  }
 0x4e1   : > { %v1136_v10 = vpack.c.bf16 %v1135_v7, %v1134_v8  ;;  %v1955_v4 = vld [vmem:[%s2392_s10 + $0x20] sm:$0xff]   ;;  %v1957_v6 = vld [vmem:[%s2392_s10 + $0x18] sm:$0xff]   ;;  %v1958_v7 = vld [vmem:[%s2392_s10 + $0x50] sm:$0xff]  }
 0x4e2   : > { %v1959_v8 = vld [vmem:[%s2392_s10 + $0x10] sm:$0xff]  }
 0x4e3   : > { %1883 = vmatmul.mubr.msk.bf16.vlgmr.msra.gmra.mxu0 %vm551_vm0, %v1136_v10  ;;  %v1960_v10 = vld [vmem:[%s2392_s10 + $0x48] sm:$0xff]  }
 0x4e4   : > { %1805 = vmatpush3.bf16.msra.mxu0 %v1949_v62 }
 0x4e5   : > { %1806 = vmatprep.subr.bf16.mxu0 %v1950_v63 }
 0x4e8   : > { %1807 = vmatpush3.bf16.msra.mxu0 %v1951_v12 }
 0x4e9   : > { %1808 = vmatprep.subr.bf16.mxu0 %v1952_v0  ;;  %v1756_v0 = vld [vmem:[%s2393_s11] ss:$0 sm:$0xff] }
 0x4ec   : > { %1809 = vmatpush3.bf16.msra.mxu0 %v1953_v1 }
 0x4ed   : > { %1810 = vmatprep.subr.bf16.mxu0 %v1954_v3 }
 0x4f0   : > { %1811 = vmatpush3.bf16.msra.mxu0 %v1955_v4 }
 0x4f1   : > { %1812 = vmatprep.subr.bf16.mxu0 %v1956_v5 }
 0x4f4   : > { %1813 = vmatpush3.bf16.msra.mxu0 %v1957_v6 }
 0x4f5   : > { %1814 = vmatprep.subr.bf16.mxu0 %v1958_v7 }
 0x4f8   : > { %1815 = vmatpush3.bf16.msra.mxu0 %v1959_v8 }
 0x4f9   : > { %1816 = vmatprep.subr.bf16.mxu0 %v1960_v10 }
 0x5a3   : > { %v1213_v16 = vpop.f32.mrf.mxu0 }
 0x5a4   : > { %v1214_v32 = vadd.f32 %v1739_v14, %v1213_v16  ;;  %v1963_v16 = vld [vmem:[%s2392_s10] sm:$0xff]  }
 0x5a5   : > { %v1884_v17 = vpop.f32.mrf.mxu0 }
 0x5a6   : > { %v1222_v18 = vadd.f32 %v1220_v15, %v1214_v32  ;;  %v1962_v15 = vld [vmem:[%s2392_s10 + $0x40] sm:$0xff]  }
 0x5a7   : > { %v1216_v20 = vpop.f32.mrf.mxu0  ;;  %v1278_v32 = vld [vmem:[%s2391_s9] sm:$0x3] }
 0x5a8   : > { %v1217_v21 = vadd.f32 %v1739_v14, %v1216_v20  ;;  %v1226_v23 = vsel %vm551_vm0, %v1222_v18, 0.0  ;;  %v1961_v14 = vld [vmem:[%s2392_s10 + $0x8] sm:$0xff]   ;;  %v1283_v17 = vrot.slane %v1278_v32, %v498_v13 }
 0x5a9   : > { %1227 = vadd.xlane.f32.xlu1 %v1226_v23  ;;  %v1885_v24 = vpop.f32.mrf.mxu0  ;;  %1817 = vmatpush3.bf16.msra.mxu0 %v1961_v14 }
 0x5aa   : > { %v1223_v25 = vadd.f32 %v1221_v19, %v1217_v21  ;;  %1818 = vmatprep.subr.bf16.mxu0 %v1962_v15 }
 0x5ac   : > { %v1229_v26 = vsel %vm551_vm0, %v1223_v25, 0.0 }
 0x5ad   : > { %1230 = vadd.xlane.f32.xlu0 %v1229_v26  ;;  %1819 = vmatpush3.bf16.msra.mxu0 %v1963_v16 }
 0x632   : > { %v1228_v27 = vpop.xlane.xlu1 %1227 }
 0x633   : > { %v1233_v28 = vmul.f32 0.015625, %v1228_v27 }
 0x635   : > { %v1235_v29 = vsub.f32 %v1222_v18, %v1233_v28  ;;  %v1287_v18 = vrot.slane %v1278_v32, %v502_v22 }
 0x636   : > { %v1231_v30 = vpop.xlane.xlu0 %1230 }
 0x637   : > { %v1234_v31 = vmul.f32 0.015625, %v1231_v30  ;;  %v1237_v33 = vmul.f32 %v1235_v29, %v1235_v29 }
 0x639   : > { %v1236_v34 = vsub.f32 %v1223_v25, %v1234_v31  ;;  %v1239_v35 = vsel %vm551_vm0, %v1237_v33, 0.0 }
 0x63a   : > { %1240 = vadd.xlane.f32.xlu0 %v1239_v35 }
 0x63b   : > { %v1238_v9 = vmul.f32 %v1236_v34, %v1236_v34 }
 0x63d   : > { %v1242_v36 = vsel %vm551_vm0, %v1238_v9, 0.0 }
 0x63e   : > { %1243 = vadd.xlane.f32.xlu1 %v1242_v36 }
 0x6c3   : > { %v1241_v45 = vpop.xlane.xlu0 %1240 }
 0x6c4   : > { %v1245_v46 = vmul.f32 0.015625, %v1241_v45 }
 0x6c6   : > { %v1247_v2 = vadd.f32 1e-12, %v1245_v46 }
 0x6c7   : > { %v1244_v47 = vpop.xlane.xlu1 %1243 }
 0x6c8   : > { %1997 = vrsqrt.f32 %v1247_v2  ;;  %v1246_v48 = vmul.f32 0.015625, %v1244_v47 }
 0x6ca   : > { %v1248_v49 = vadd.f32 1e-12, %v1246_v48 }
 0x6cc   : > { %1999 = vrsqrt.f32 %v1248_v49 }
 0x6d5   : > { %v1998_v50 = vpop.eup %1997 }
 0x6d6   : > { %v1251_v51 = vmul.f32 %v1998_v50, %v1235_v29 }
 0x6d8   : > { %v1259_v55 = vmul.f32 %v1745_v52, %v1251_v51 }
 0x6d9   : > { %v2000_v53 = vpop.eup %1999 }
 0x6da   : > { %v1252_v54 = vmul.f32 %v2000_v53, %v1236_v34  ;;  %v2297_v58 = vadd.f32 %v1746_v56, %v1259_v55 }
 0x6dc   : > { %v1260_v57 = vmul.f32 %v1745_v52, %v1252_v54 }
 0x6de   : > { %v2299_v59 = vadd.f32 %v1746_v56, %v1260_v57 }
 0x6e0   : > { %v1269_v60 = vpack.c.bf16 %v2299_v59, %v2297_v58 }
 0x6e2   : > { %1755 = vmatmul.mubr.msk.bf16.vlgmr.msra.gmra.mxu1 %vm551_vm0, %v1269_v60 }
 0x7a2   : > { %v1367_v19 = vpop.f32.mrf.mxu1 }
 0x7a3   : > { %v1368_v20 = vadd.f32 %v1367_v19, %v1283_v17 }
 0x7a4   : > { %v1369_v21 = vpop.f32.mrf.mxu1 }
 0x7a5   : > { %v1376_v23 = vmul.f32 %v1368_v20, %v1368_v20  ;;  %v1370_v24 = vadd.f32 %v1369_v21, %v1287_v18 }
 0x7a6   : > { %v1371_v25 = vpop.f32.mrf.mxu1 }
 0x7a7   : > { %v1380_v26 = vmul.f32 %v1376_v23, %v1368_v20  ;;  %v1377_v27 = vmul.f32 %v1370_v24, %v1370_v24  ;;  %v1372_v28 = vadd.f32 %v1371_v25, %v1283_v17 }
 0x7a8   : > { %v1373_v29 = vpop.f32.mrf.mxu1 }
 0x7a9   : > { %v1384_v30 = vmul.f32 0.044715, %v1380_v26  ;;  %v1381_v31 = vmul.f32 %v1377_v27, %v1370_v24  ;;  %v1378_v33 = vmul.f32 %v1372_v28, %v1372_v28  ;;  %v1374_v34 = vadd.f32 %v1373_v29, %v1287_v18 }
 0x7ab   : > { %v1388_v35 = vadd.f32 %v1384_v30, %v1368_v20  ;;  %v1385_v9 = vmul.f32 0.044715, %v1381_v31  ;;  %v1382_v13 = vmul.f32 %v1378_v33, %v1372_v28  ;;  %v1379_v36 = vmul.f32 %v1374_v34, %v1374_v34  ;;  %v1773_v33 = vld [vmem:[%s2394_s12] ss:$0 sm:$0xff] }
 0x7ad   : > { %v1392_v11 = vmul.f32 0.7978846, %v1388_v35  ;;  %v1389_v22 = vadd.f32 %v1385_v9, %v1370_v24  ;;  %v1386_v37 = vmul.f32 0.044715, %v1382_v13  ;;  %v1383_v38 = vmul.f32 %v1379_v36, %v1374_v34  ;;  %v1774_v35 = vld [vmem:[%s2395_s13] ss:$0 sm:$0xff] }
 0x7af   : > { %v1393_v39 = vmul.f32 0.7978846, %v1389_v22  ;;  %v1390_v40 = vadd.f32 %v1386_v37, %v1372_v28  ;;  %v1387_v41 = vmul.f32 0.044715, %v1383_v38  ;;  %2001 = vtanh.f32 %v1392_v11 }
 0x7b1   : > { %2003 = vtanh.f32 %v1393_v39  ;;  %v1394_v42 = vmul.f32 0.7978846, %v1390_v40  ;;  %v1391_v43 = vadd.f32 %v1387_v41, %v1374_v34 }
 0x7b3   : > { %2005 = vtanh.f32 %v1394_v42  ;;  %v1395_v44 = vmul.f32 0.7978846, %v1391_v43 }
 0x7b5   : > { %2007 = vtanh.f32 %v1395_v44 }
 0x7bc   : > { %v2002_v45 = vpop.eup %2001 }
 0x7bd   : > { %v1400_v48 = vadd.f32 1.0, %v2002_v45 }
 0x7be   : > { %v2004_v46 = vpop.eup %2003 }
 0x7bf   : > { %v1401_v2 = vadd.f32 1.0, %v2004_v46  ;;  %v1404_v54 = vmul.f32 0.5, %v1400_v48 }
 0x7c0   : > { %v2006_v47 = vpop.eup %2005 }
 0x7c1   : > { %v1402_v49 = vadd.f32 1.0, %v2006_v47  ;;  %v1405_v53 = vmul.f32 0.5, %v1401_v2  ;;  %v1408_v61 = vmul.f32 %v1404_v54, %v1368_v20 }
 0x7c2   : > { %v2008_v50 = vpop.eup %2007 }
 0x7c3   : > { %v1406_v51 = vmul.f32 0.5, %v1402_v49  ;;  %v1403_v52 = vadd.f32 1.0, %v2008_v50  ;;  %v1409_v57 = vmul.f32 %v1405_v53, %v1370_v24 }
 0x7c5   : > { %v1407_v55 = vmul.f32 0.5, %v1403_v52  ;;  %v1410_v56 = vmul.f32 %v1406_v51, %v1372_v28 }
 0x7c7   : > { %v1411_v60 = vmul.f32 %v1407_v55, %v1374_v34  ;;  %v1412_v63 = vpack.c.bf16 %v1410_v56, %v1408_v61 }
 0x7c9   : > { %v1413_v62 = vpack.c.bf16 %v1411_v60, %v1409_v57 }
 0x7cb   : > { %1581 = vmatprep.mubr.bf16.mxu0 %v1413_v62 }
 0x7cc   : > { %1582 = vmatmul.mubr.bf16.vlgmr.msra.gmra.mxu0 %v1412_v63 }
 0x88c   : > { %v1820_v12 = vpop.f32.mrf.mxu0 }
 0x88e   : > { %v1821_v1 = vpop.f32.mrf.mxu0 }
 0x88f   : > { %v1822_v3 = vadd.f32 %v1821_v1, %v1820_v12 }
 0x890   : > { %v1823_v4 = vpop.f32.mrf.mxu0 }
 0x891   : > { %v1584_v5 = vadd.f32 %v1822_v3, %v1756_v0 }
 0x892   : > { %v1824_v6 = vpop.f32.mrf.mxu0 }
 0x893   : > { %v1825_v7 = vadd.f32 %v1824_v6, %v1823_v4  ;;  %v1590_v8 = vadd.f32 %v1584_v5, %v2297_v58 }
 0x895   : > { %v1587_v10 = vadd.f32 %v1825_v7, %v1756_v0  ;;  %v1594_v14 = vsel %vm551_vm0, %v1590_v8, 0.0 }
 0x896   : > { %1595 = vadd.xlane.f32.xlu0 %v1594_v14 }
 0x897   : > { %v1591_v15 = vadd.f32 %v1587_v10, %v2299_v59 }
 0x899   : > { %v1597_v16 = vsel %vm551_vm0, %v1591_v15, 0.0 }
 0x89a   : > { %1598 = vadd.xlane.f32.xlu1 %v1597_v16 }
 0x91f   : > { %v1596_v32 = vpop.xlane.xlu0 %1595 }
 0x920   : > { %v1600_v17 = vmul.f32 0.015625, %v1596_v32 }
 0x922   : > { %v1602_v18 = vsub.f32 %v1590_v8, %v1600_v17 }
 0x923   : > { %v1599_v19 = vpop.xlane.xlu1 %1598 }
 0x924   : > { %v1601_v20 = vmul.f32 0.015625, %v1599_v19  ;;  %v1604_v21 = vmul.f32 %v1602_v18, %v1602_v18 }
 0x926   : > { %v1603_v23 = vsub.f32 %v1591_v15, %v1601_v20  ;;  %v1606_v24 = vsel %vm551_vm0, %v1604_v21, 0.0 }
 0x927   : > { %1607 = vadd.xlane.f32.xlu0 %v1606_v24 }
 0x928   : > { %v1605_v58 = vmul.f32 %v1603_v23, %v1603_v23 }
 0x92a   : > { %v1609_v25 = vsel %vm551_vm0, %v1605_v58, 0.0 }
 0x92b   : > { %1610 = vadd.xlane.f32.xlu1 %v1609_v25 }
 0x9b0   : > { %v1608_v26 = vpop.xlane.xlu0 %1607 }
 0x9b1   : > { %v1612_v59 = vmul.f32 0.015625, %v1608_v26 }
 0x9b3   : > { %v1614_v27 = vadd.f32 1e-12, %v1612_v59 }
 0x9b4   : > { %v1611_v28 = vpop.xlane.xlu1 %1610 }
 0x9b5   : > { %2009 = vrsqrt.f32 %v1614_v27  ;;  %v1613_v29 = vmul.f32 0.015625, %v1611_v28 }
 0x9b7   : > { %v1615_v30 = vadd.f32 1e-12, %v1613_v29 }
 0x9b9   : > { %2011 = vrsqrt.f32 %v1615_v30 }
 0x9c2   : > { %v2010_v31 = vpop.eup %2009 }
 0x9c3   : > { %v1618_v34 = vmul.f32 %v2010_v31, %v1602_v18 }
 0x9c5   : > { %v1626_v9 = vmul.f32 %v1773_v33, %v1618_v34 }
 0x9c6   : > { %v2012_v13 = vpop.eup %2011 }
 0x9c7   : > { %v1634_v36 = vadd.f32 %v1774_v35, %v1626_v9  ;;  %v1619_v11 = vmul.f32 %v2012_v13, %v1603_v23 }
 0x9c9   : > { %v1781_v22 = vpack.c.bf16 %v1634_v36, %v1634_v36  ;;  %v1627_v37 = vmul.f32 %v1773_v33, %v1619_v11 }
 0x9cb   : > { %1645 = vst.msk [vmem:[%s481_s16] sm:$0xf] %vm1644_vm5, %v1781_v22  ;;  %v1635_v38 = vadd.f32 %v1774_v35, %v1627_v37 }
 0x9cd   : > { %v1782_v39 = vpack.c.bf16 %v1635_v38, %v1635_v38 }
 0x9cf   : > { %1646 = vst.msk [vmem:[%s481_s16 + $0x4] sm:$0xf] %vm1644_vm5, %v1782_v39 }
 0x9d0 PF: > { %s24_s29 = sadd.s32 1, %s2019_s29  }
 0x9d1   : > { %p21_p4 = scmp.ge.s32.totalorder %s24_s29, 4  }
 0x9d3   :  { %23 = sbr.rel (!%p21_p4) target bundleno = 1 (0x1), region = 109 }

</bundles_post_ra>
